<compile_context>
chip_gen: v5e
topology: v5e:2x2
jax: 0.10.0
libtpu: 0.0.40
codegen_flags: <defaults>
</compile_context>

<pallas_src>
import math
from functools import partial

import jax
import jax.numpy as jnp
from jax.experimental import pallas as pl
from jax.experimental.pallas import tpu as pltpu

_EPS = 1e-5
_NEG_SLOPE = 0.01  # nn.LeakyReLU default


# --------------------------------------------------------------------------
# Pallas kernels
# --------------------------------------------------------------------------
def _conv_ln_act_kernel(x_ref, w_ref, b_ref, a_ref, g_ref, be_ref, o_ref,
                        *, ks, Wo):
    """One output row: lifted conv (fused im2col) + bias + group-LN + LeakyReLU."""
    ho = pl.program_id(1)
    Ncol = o_ref.shape[-1]
    acc = jnp.zeros((Wo, Ncol), jnp.float32)
    t = 0
    for dy in range(ks):
        for dx in range(ks):
            piece = x_ref[0, ho + dy, pl.ds(dx, Wo), :].astype(jnp.bfloat16)
            acc = acc + jnp.dot(piece, w_ref[t],
                                preferred_element_type=jnp.float32)
            t += 1
    acc = acc + b_ref[...]
    # SE2LayerNorm over the channel sub-groups via a block-diagonal mean matmul.
    mean = jnp.dot(acc, a_ref[...], preferred_element_type=jnp.float32)
    xc = acc - mean
    var = jnp.dot(xc * xc, a_ref[...], preferred_element_type=jnp.float32)
    y = xc * jax.lax.rsqrt(var + _EPS) * g_ref[...] + be_ref[...]
    y = jnp.where(y >= 0, y, _NEG_SLOPE * y)
    o_ref[0, 0] = y.astype(o_ref.dtype)


def _convnext_kernel(x_ref, wc_ref, bc_ref, a_ref, g_ref, be_ref,
                     w1_ref, b1_ref, w2_ref, b2_ref, o_ref, *, ks, Wo):
    """One output row of the SE(2) ConvNeXt block:
    group conv + bias -> LN -> pw C->4C -> GELU -> pw 4C->C -> + cropped residual."""
    ho = pl.program_id(1)
    NC = o_ref.shape[-1]
    acc = jnp.zeros((Wo, NC), jnp.float32)
    t = 0
    for dy in range(ks):
        for dx in range(ks):
            piece = x_ref[0, ho + dy, pl.ds(dx, Wo), :].astype(jnp.bfloat16)
            acc = acc + jnp.dot(piece, wc_ref[t],
                                preferred_element_type=jnp.float32)
            t += 1
    acc = acc + bc_ref[...]
    mean = jnp.dot(acc, a_ref[...], preferred_element_type=jnp.float32)
    xc = acc - mean
    var = jnp.dot(xc * xc, a_ref[...], preferred_element_type=jnp.float32)
    y = xc * jax.lax.rsqrt(var + _EPS) * g_ref[...] + be_ref[...]
    h = jnp.dot(y.astype(jnp.bfloat16), w1_ref[...],
                preferred_element_type=jnp.float32) + b1_ref[...]
    # tanh-approx GELU.  TODO(synk): PyTorch nn.GELU default is exact erf.
    c0 = jnp.float32(0.7978845608028654)
    h = 0.5 * h * (1.0 + jnp.tanh(c0 * (h + 0.044715 * h * h * h)))
    out = jnp.dot(h.astype(jnp.bfloat16), w2_ref[...],
                  preferred_element_type=jnp.float32) + b2_ref[...]
    crop = (ks - 1) // 2
    res = x_ref[0, ho + crop, pl.ds(crop, Wo), :]   # cropped residual, already in VMEM
    o_ref[0, 0] = (out + res).astype(o_ref.dtype)


def _conv_kernel(x_ref, w_ref, b_ref, o_ref, *, ks, Wo):
    """One output row: SE(2) group conv (fused im2col) + bias, no activation."""
    ho = pl.program_id(1)
    Ncol = o_ref.shape[-1]
    acc = jnp.zeros((Wo, Ncol), jnp.float32)
    t = 0
    for dy in range(ks):
        for dx in range(ks):
            piece = x_ref[0, ho + dy, pl.ds(dx, Wo), :].astype(jnp.bfloat16)
            acc = acc + jnp.dot(piece, w_ref[t],
                                preferred_element_type=jnp.float32)
            t += 1
    o_ref[0, 0] = (acc + b_ref[...]).astype(o_ref.dtype)


def _pool_kernel(x_ref, o_ref):
    """2x2/2 spatial max pool.  Input is the full image as [1, H2, 2, W2, 2*C]
    (free contiguous reshape outside); W-pairs live on the lane axis."""
    v = x_ref[0]                          # [H2, 2, W2, 2*C]
    m = jnp.maximum(v[:, 0], v[:, 1])     # [H2, W2, 2*C]
    C = m.shape[-1] // 2
    o_ref[0] = jnp.maximum(m[..., :C], m[..., C:])


# --------------------------------------------------------------------------
# pallas_call wrappers (grid = (batch, output row); image DMAed once per batch)
# --------------------------------------------------------------------------
def lift_stage(x, w_taps, bias, A, gamma, beta, *, ks):
    B, H, Wd, Cin = x.shape
    T, F, Ncol = w_taps.shape
    Ho, Wo = H - ks + 1, Wd - ks + 1
    return pl.pallas_call(
        partial(_conv_ln_act_kernel, ks=ks, Wo=Wo),
        out_shape=jax.ShapeDtypeStruct((B, Ho, Wo, Ncol), jnp.float32),
        grid=(B, Ho),
        in_specs=[
            pl.BlockSpec((1, H, Wd, Cin), lambda b, h: (b, 0, 0, 0)),
            pl.BlockSpec((T, F, Ncol), lambda b, h: (0, 0, 0)),
            pl.BlockSpec((1, Ncol), lambda b, h: (0, 0)),
            pl.BlockSpec((Ncol, Ncol), lambda b, h: (0, 0)),
            pl.BlockSpec((1, Ncol), lambda b, h: (0, 0)),
            pl.BlockSpec((1, Ncol), lambda b, h: (0, 0)),
        ],
        out_specs=pl.BlockSpec((1, 1, Wo, Ncol), lambda b, h: (b, h, 0, 0)),
        compiler_params=pltpu.CompilerParams(
            dimension_semantics=("parallel", "arbitrary")),
    )(x, w_taps, bias, A, gamma, beta)


def convnext_stage(x, blk, *, ks):
    B, H, Wd, NC = x.shape
    T, F, Ncol = blk["conv_w"].shape
    H4 = blk["pw1_w"].shape[-1]
    Ho, Wo = H - ks + 1, Wd - ks + 1
    return pl.pallas_call(
        partial(_convnext_kernel, ks=ks, Wo=Wo),
        out_shape=jax.ShapeDtypeStruct((B, Ho, Wo, NC), jnp.float32),
        grid=(B, Ho),
        in_specs=[
            pl.BlockSpec((1, H, Wd, NC), lambda b, h: (b, 0, 0, 0)),
            pl.BlockSpec((T, F, Ncol), lambda b, h: (0, 0, 0)),
            pl.BlockSpec((1, NC), lambda b, h: (0, 0)),
            pl.BlockSpec((NC, NC), lambda b, h: (0, 0)),
            pl.BlockSpec((1, NC), lambda b, h: (0, 0)),
            pl.BlockSpec((1, NC), lambda b, h: (0, 0)),
            pl.BlockSpec((NC, H4), lambda b, h: (0, 0)),
            pl.BlockSpec((1, H4), lambda b, h: (0, 0)),
            pl.BlockSpec((H4, NC), lambda b, h: (0, 0)),
            pl.BlockSpec((1, NC), lambda b, h: (0, 0)),
        ],
        out_specs=pl.BlockSpec((1, 1, Wo, NC), lambda b, h: (b, h, 0, 0)),
        compiler_params=pltpu.CompilerParams(
            dimension_semantics=("parallel", "arbitrary")),
    )(x, blk["conv_w"], blk["conv_b"], blk["ln_A"], blk["ln_g"], blk["ln_b"],
      blk["pw1_w"], blk["pw1_b"], blk["pw2_w"], blk["pw2_b"])


def final_conv(x, w_taps, bias, *, ks):
    B, H, Wd, NC = x.shape
    T, F, Ncol = w_taps.shape
    Ho, Wo = H - ks + 1, Wd - ks + 1
    return pl.pallas_call(
        partial(_conv_kernel, ks=ks, Wo=Wo),
        out_shape=jax.ShapeDtypeStruct((B, Ho, Wo, Ncol), jnp.float32),
        grid=(B, Ho),
        in_specs=[
            pl.BlockSpec((1, H, Wd, NC), lambda b, h: (b, 0, 0, 0)),
            pl.BlockSpec((T, F, Ncol), lambda b, h: (0, 0, 0)),
            pl.BlockSpec((1, Ncol), lambda b, h: (0, 0)),
        ],
        out_specs=pl.BlockSpec((1, 1, Wo, Ncol), lambda b, h: (b, h, 0, 0)),
        compiler_params=pltpu.CompilerParams(
            dimension_semantics=("parallel", "arbitrary")),
    )(x, w_taps, bias)


def spatial_maxpool2(y):
    B, H, Wd, C = y.shape
    H2, W2 = H // 2, Wd // 2
    y = y[:, :H2 * 2, :W2 * 2, :]
    y6 = y.reshape(B, H2, 2, W2, 2 * C)   # free contiguous reshape (no copy)
    return pl.pallas_call(
        _pool_kernel,
        out_shape=jax.ShapeDtypeStruct((B, H2, W2, C), jnp.float32),
        grid=(B,),
        in_specs=[pl.BlockSpec((1, H2, 2, W2, 2 * C), lambda b: (b, 0, 0, 0, 0))],
        out_specs=pl.BlockSpec((1, H2, W2, C), lambda b: (b, 0, 0, 0)),
        compiler_params=pltpu.CompilerParams(dimension_semantics=("parallel",)),
    )(y6)


# --------------------------------------------------------------------------
# One-time weight transform (hoisted out of the jitted forward)
# --------------------------------------------------------------------------
def rotate_kernel_2d(w, angle):
    """Bilinear rotation of the last two (ks, ks) dims by `angle` (zero pad)."""
    ks = w.shape[-1]
    c = (ks - 1) / 2.0
    ys, xs = jnp.meshgrid(
        jnp.arange(ks, dtype=jnp.float32),
        jnp.arange(ks, dtype=jnp.float32),
        indexing="ij",
    )
    cosa, sina = math.cos(angle), math.sin(angle)
    y0, x0 = ys - c, xs - c
    src_y = cosa * y0 + sina * x0 + c
    src_x = -sina * y0 + cosa * x0 + c
    y_fl = jnp.floor(src_y)
    x_fl = jnp.floor(src_x)
    ty = src_y - y_fl
    tx = src_x - x_fl

    def gather(yy, xx):
        valid = (yy >= 0) & (yy < ks) & (xx >= 0) & (xx < ks)
        yy_c = jnp.clip(yy, 0, ks - 1).astype(jnp.int32)
        xx_c = jnp.clip(xx, 0, ks - 1).astype(jnp.int32)
        vals = w[..., yy_c, xx_c]
        return jnp.where(valid, vals, 0.0)

    w00 = gather(y_fl, x_fl)
    w01 = gather(y_fl, x_fl + 1)
    w10 = gather(y_fl + 1, x_fl)
    w11 = gather(y_fl + 1, x_fl + 1)
    return ((1 - ty) * (1 - tx) * w00 + (1 - ty) * tx * w01
            + ty * (1 - tx) * w10 + ty * tx * w11)


def prepare_params(params, *, N, ks):
    """Rotation / orientation roll / GEMM repacking / bias & LN tiling, done once."""

    def lift_taps(w, b):
        Cout, Cin, _, _ = w.shape
        cols = []
        for n in range(N):
            wn = rotate_kernel_2d(w, 2.0 * math.pi * n / N)          # [Cout,Cin,ks,ks]
            cols.append(jnp.transpose(wn, (2, 3, 1, 0)).reshape(ks * ks * Cin, Cout))
        W = jnp.concatenate(cols, axis=-1)                           # [K, N*Cout]
        Wt = W.reshape(ks * ks, Cin, N * Cout).astype(jnp.bfloat16)  # per-tap weights
        return Wt, jnp.tile(b, N).reshape(1, N * Cout).astype(jnp.float32)

    def group_taps(w, b):
        Cout, Cin, Nn, _, _ = w.shape
        cols = []
        for n in range(N):
            wn = rotate_kernel_2d(w, 2.0 * math.pi * n / N)          # spatial rotation
            wn = jnp.roll(wn, shift=n, axis=2)                       # orientation cycle
            cols.append(jnp.transpose(wn, (3, 4, 2, 1, 0)).reshape(ks * ks * Nn * Cin, Cout))
        W = jnp.concatenate(cols, axis=-1)                           # [K, N*Cout]
        Wt = W.reshape(ks * ks, Nn * Cin, N * Cout).astype(jnp.bfloat16)
        return Wt, jnp.tile(b, N).reshape(1, N * Cout).astype(jnp.float32)

    def ln_prep(g, b):
        C = g.shape[0]
        A = jnp.kron(jnp.eye(N, dtype=jnp.float32),
                     jnp.full((C, C), 1.0 / C, jnp.float32))         # group-mean matrix
        return (A,
                jnp.tile(g, N).reshape(1, N * C).astype(jnp.float32),
                jnp.tile(b, N).reshape(1, N * C).astype(jnp.float32))

    lw, lb = lift_taps(params["lift_w"], params["lift_b"])
    A0, g0, b0 = ln_prep(params["ln0_g"], params["ln0_b"])
    prep = {"lift_w": lw, "lift_b": lb, "ln0_A": A0, "ln0_g": g0, "ln0_b": b0,
            "blocks": []}
    eyeN = jnp.eye(N, dtype=jnp.float32)
    for blk in params["blocks"]:
        cw, cb = group_taps(blk["conv_w"], blk["conv_b"])
        A, g, b = ln_prep(blk["ln_g"], blk["ln_b"])
        prep["blocks"].append({
            "conv_w": cw, "conv_b": cb, "ln_A": A, "ln_g": g, "ln_b": b,
            # per-orientation pointwise convs as block-diagonal matrices
            "pw1_w": jnp.kron(eyeN, blk["pw1_w"]).astype(jnp.bfloat16),
            "pw1_b": jnp.tile(blk["pw1_b"], N).reshape(1, -1).astype(jnp.float32),
            "pw2_w": jnp.kron(eyeN, blk["pw2_w"]).astype(jnp.bfloat16),
            "pw2_b": jnp.tile(blk["pw2_b"], N).reshape(1, -1).astype(jnp.float32),
        })
    fw, fb = group_taps(params["final_w"], params["final_b"])
    prep["final_w"] = fw
    prep["final_b"] = fb
    return prep


# --------------------------------------------------------------------------
# Forward pass
# --------------------------------------------------------------------------
def encoder_forward(x_nchw, prep, *, N, ks):
    x = jnp.transpose(x_nchw, (0, 2, 3, 1)).astype(jnp.float32)   # NCHW -> NHWC
    y = lift_stage(x, prep["lift_w"], prep["lift_b"],
                   prep["ln0_A"], prep["ln0_g"], prep["ln0_b"], ks=ks)
    y = spatial_maxpool2(y)
    for blk in prep["blocks"]:
        y = convnext_stage(y, blk, ks=ks)
        y = spatial_maxpool2(y)
    y = final_conv(y, prep["final_w"], prep["final_b"], ks=ks)
    B, Ho, Wo, NCout = y.shape
    y = y.reshape(B, Ho, Wo, N, NCout // N)
    return jnp.transpose(y, (0, 4, 3, 1, 2))   # [B, k+2, N, Ho, Wo]


# --------------------------------------------------------------------------
# Pure-JAX reference (mirrors the kernel math, incl. bf16 GEMM operands)
# --------------------------------------------------------------------------
def reference_forward(x_nchw, prep, *, N, ks):
    x = jnp.transpose(x_nchw, (0, 2, 3, 1)).astype(jnp.float32)

    def conv(xa, w_taps, bias):
        B, H, Wd, _ = xa.shape
        T, _, Ncol = w_taps.shape
        Ho, Wo = H - ks + 1, Wd - ks + 1
        acc = jnp.zeros((B, Ho, Wo, Ncol), jnp.float32)
        t = 0
        for dy in range(ks):
            for dx in range(ks):
                piece = xa[:, dy:dy + Ho, dx:dx + Wo, :].astype(jnp.bfloat16)
                acc = acc + jnp.einsum("bhwf,fc->bhwc", piece, w_taps[t],
                                       preferred_element_type=jnp.float32)
                t += 1
        return acc + bias.reshape(1, 1, 1, -1)

    def group_ln(a, A, g, b):
        mean = jnp.einsum("bhwc,cd->bhwd", a, A)
        xc = a - mean
        var = jnp.einsum("bhwc,cd->bhwd", xc * xc, A)
        return xc * jax.lax.rsqrt(var + _EPS) * g.reshape(1, 1, 1, -1) + b.reshape(1, 1, 1, -1)

    def pool(a):
        B, H, Wd, C = a.shape
        a = a[:, :H // 2 * 2, :Wd // 2 * 2, :]
        return jnp.max(a.reshape(B, H // 2, 2, Wd // 2, 2, C), axis=(2, 4))

    def gelu_tanh(h):
        c0 = jnp.float32(0.7978845608028654)
        return 0.5 * h * (1.0 + jnp.tanh(c0 * (h + 0.044715 * h * h * h)))

    y = conv(x, prep["lift_w"], prep["lift_b"])
    y = group_ln(y, prep["ln0_A"], prep["ln0_g"], prep["ln0_b"])
    y = jnp.where(y >= 0, y, _NEG_SLOPE * y)
    y = pool(y)
    for blk in prep["blocks"]:
        B, H, Wd, _ = y.shape
        Ho, Wo = H - ks + 1, Wd - ks + 1
        a = conv(y, blk["conv_w"], blk["conv_b"])
        a = group_ln(a, blk["ln_A"], blk["ln_g"], blk["ln_b"])
        h = jnp.einsum("bhwc,cd->bhwd", a.astype(jnp.bfloat16), blk["pw1_w"],
                       preferred_element_type=jnp.float32) + blk["pw1_b"].reshape(1, 1, 1, -1)
        h = gelu_tanh(h)
        o = jnp.einsum("bhwc,cd->bhwd", h.astype(jnp.bfloat16), blk["pw2_w"],
                       preferred_element_type=jnp.float32) + blk["pw2_b"].reshape(1, 1, 1, -1)
        crop = (ks - 1) // 2
        y = o + y[:, crop:crop + Ho, crop:crop + Wo, :]
        y = pool(y)
    y = conv(y, prep["final_w"], prep["final_b"])
    B, Ho, Wo, NCout = y.shape
    y = y.reshape(B, Ho, Wo, N, NCout // N)
    return jnp.transpose(y, (0, 4, 3, 1, 2))


# --------------------------------------------------------------------------
# Deterministic synthetic parameters
# --------------------------------------------------------------------------
def init_params(key, input_dim, hidden, depth, k_lat, N, ks):
    state = {"key": key}

    def nxt():
        state["key"], sub = jax.random.split(state["key"])
        return sub

    def dense(shape, fan_in):
        return jax.random.normal(nxt(), shape, jnp.float32) / math.sqrt(fan_in)

    p = {
        "lift_w": dense((hidden, input_dim, ks, ks), input_dim * ks * ks),
        "lift_b": jnp.zeros((hidden,), jnp.float32),
        "ln0_g": jnp.ones((hidden,), jnp.float32),
        "ln0_b": jnp.zeros((hidden,), jnp.float32),
        "blocks": [],
    }
    for _ in range(depth - 2):
        p["blocks"].append({
            "conv_w": dense((hidden, hidden, N, ks, ks), hidden * N * ks * ks),
            "conv_b": jnp.zeros((hidden,), jnp.float32),
            "ln_g": jnp.ones((hidden,), jnp.float32),
            "ln_b": jnp.zeros((hidden,), jnp.float32),
            "pw1_w": dense((hidden, 4 * hidden), hidden),
            "pw1_b": jnp.zeros((4 * hidden,), jnp.float32),
            "pw2_w": dense((4 * hidden, hidden), 4 * hidden),
            "pw2_b": jnp.zeros((hidden,), jnp.float32),
        })
    out_ch = k_lat + 1 + 1
    p["final_w"] = dense((out_ch, hidden, N, ks, ks), hidden * N * ks * ks)
    p["final_b"] = jnp.zeros((out_ch,), jnp.float32)
    return p


if __name__ == "__main__":
    # Encoder(input_dim=3, hidden_dim=8, depth=3, k=4, N=4, kernel_size=3)
    # on a batch of 2 images of 22x22 (22->20->10->8->4->2 through the stack).
    input_dim, hidden, depth, k_lat, N, ks = 3, 8, 3, 4, 4, 3
    B, H, W = 2, 22, 22

    key = jax.random.PRNGKey(0)
    k_x, k_p = jax.random.split(key)
    x = jax.random.normal(k_x, (B, input_dim, H, W), jnp.float32)
    params = init_params(k_p, input_dim, hidden, depth, k_lat, N, ks)

    # one-time weight transform (hoisted out of the jitted hot path)
    prep = prepare_params(params, N=N, ks=ks)

    fwd = jax.jit(partial(encoder_forward, N=N, ks=ks))
    out = jax.block_until_ready(fwd(x, prep))
    ref = jax.block_until_ready(reference_forward(x, prep, N=N, ks=ks))

    expected_cout = k_lat + 1 + 1
    assert out.shape == (B, expected_cout, N, 2, 2), out.shape
    assert bool(jnp.all(jnp.isfinite(out)))
    assert bool(jnp.allclose(out, ref, atol=5e-2, rtol=5e-2)), \
        float(jnp.max(jnp.abs(out - ref)))
    print("KERNEL_OK")
</pallas_src>

<mosaic_0001>
module attributes {stable_mosaic.version = 11 : i64} {
  func.func @_pool_kernel(%arg0: i32, %arg1: memref<1x10x2x10x64xf32, #tpu.memory_space<vmem>>, %arg2: memref<1x10x10x32xf32, #tpu.memory_space<vmem>>) attributes {dimension_semantics = [#tpu.dimension_semantics<parallel>], iteration_bounds = array<i64: 2>, scalar_prefetch = 0 : i64, scratch_operands = 0 : i64, tpu.core_type = #tpu.core_type<tc>, window_params = [{transform_indices = @transform_0, window_bounds = array<i64: 1, 10, 2, 10, 64>}, {transform_indices = @transform_1, window_bounds = array<i64: 1, 10, 10, 32>}]} {
    %c0 = arith.constant 0 : index
    %c0_0 = arith.constant 0 : index
    %c0_1 = arith.constant 0 : index
    %c0_2 = arith.constant 0 : index
    %c0_3 = arith.constant 0 : index
    %0 = vector.load %arg1[%c0, %c0_0, %c0_1, %c0_2, %c0_3] : memref<1x10x2x10x64xf32, #tpu.memory_space<vmem>>, vector<1x10x2x10x64xf32>
    %1 = vector.shape_cast %0 : vector<1x10x2x10x64xf32> to vector<10x2x10x64xf32>
    %2 = vector.extract_strided_slice %1 {offsets = [0, 0, 0, 0], sizes = [10, 1, 10, 64], strides = [1, 1, 1, 1]} : vector<10x2x10x64xf32> to vector<10x1x10x64xf32>
    %3 = vector.shape_cast %2 : vector<10x1x10x64xf32> to vector<10x10x64xf32>
    %4 = vector.extract_strided_slice %1 {offsets = [0, 1, 0, 0], sizes = [10, 1, 10, 64], strides = [1, 1, 1, 1]} : vector<10x2x10x64xf32> to vector<10x1x10x64xf32>
    %5 = vector.shape_cast %4 : vector<10x1x10x64xf32> to vector<10x10x64xf32>
    %6 = arith.maximumf %3, %5 : vector<10x10x64xf32>
    %7 = vector.extract_strided_slice %6 {offsets = [0, 0, 0], sizes = [10, 10, 32], strides = [1, 1, 1]} : vector<10x10x64xf32> to vector<10x10x32xf32>
    %8 = vector.extract_strided_slice %6 {offsets = [0, 0, 32], sizes = [10, 10, 32], strides = [1, 1, 1]} : vector<10x10x64xf32> to vector<10x10x32xf32>
    %9 = arith.maximumf %7, %8 : vector<10x10x32xf32>
    %c0_4 = arith.constant 0 : index
    %c0_5 = arith.constant 0 : index
    %c0_6 = arith.constant 0 : index
    %c0_7 = arith.constant 0 : index
    %10 = vector.load %arg2[%c0_4, %c0_5, %c0_6, %c0_7] : memref<1x10x10x32xf32, #tpu.memory_space<vmem>>, vector<1x10x10x32xf32>
    %11 = vector.shape_cast %10 : vector<1x10x10x32xf32> to vector<10x10x32xf32>
    %12 = vector.shape_cast %9 : vector<10x10x32xf32> to vector<1x10x10x32xf32>
    tpu.vector_store %arg2[%c0_4, %c0_5, %c0_6, %c0_7], %12 {strides = array<i32>} : memref<1x10x10x32xf32, #tpu.memory_space<vmem>>, vector<1x10x10x32xf32>,
    return
  }
  func.func @transform_0(%arg0: i32) -> (i32, i32, i32, i32, i32) {
    %c0_i32 = arith.constant 0 : i32
    %c0_i32_0 = arith.constant 0 : i32
    %c0_i32_1 = arith.constant 0 : i32
    %c0_i32_2 = arith.constant 0 : i32
    %c0_i32_3 = arith.constant 0 : i32
    return %arg0, %c0_i32, %c0_i32_0, %c0_i32_1, %c0_i32_2 : i32, i32, i32, i32, i32
  }
  func.func @transform_1(%arg0: i32) -> (i32, i32, i32, i32) {
    %c0_i32 = arith.constant 0 : i32
    %c0_i32_0 = arith.constant 0 : i32
    %c0_i32_1 = arith.constant 0 : i32
    %c0_i32_2 = arith.constant 0 : i32
    return %arg0, %c0_i32, %c0_i32_0, %c0_i32_1 : i32, i32, i32, i32
  }
}

module attributes {stable_mosaic.version = 11 : i64} {
  func.func @_conv_ln_act_kernel(%arg0: i32, %arg1: i32, %arg2: memref<1x22x22x3xf32, #tpu.memory_space<vmem>>, %arg3: memref<9x3x32xbf16, #tpu.memory_space<vmem>>, %arg4: memref<1x32xf32, #tpu.memory_space<vmem>>, %arg5: memref<32x32xf32, #tpu.memory_space<vmem>>, %arg6: memref<1x32xf32, #tpu.memory_space<vmem>>, %arg7: memref<1x32xf32, #tpu.memory_space<vmem>>, %arg8: memref<1x1x20x32xf32, #tpu.memory_space<vmem>>) attributes {dimension_semantics = [#tpu.dimension_semantics<parallel>, #tpu.dimension_semantics<arbitrary>], iteration_bounds = array<i64: 2, 20>, scalar_prefetch = 0 : i64, scratch_operands = 0 : i64, tpu.core_type = #tpu.core_type<tc>, window_params = [{transform_indices = @transform_0, window_bounds = array<i64: 1, 22, 22, 3>}, {pipeline_mode = #tpu.pipeline_mode<synchronous>, transform_indices = @transform_1, window_bounds = array<i64: 9, 3, 32>}, {pipeline_mode = #tpu.pipeline_mode<synchronous>, transform_indices = @transform_2, window_bounds = array<i64: 1, 32>}, {pipeline_mode = #tpu.pipeline_mode<synchronous>, transform_indices = @transform_3, window_bounds = array<i64: 32, 32>}, {pipeline_mode = #tpu.pipeline_mode<synchronous>, transform_indices = @transform_4, window_bounds = array<i64: 1, 32>}, {pipeline_mode = #tpu.pipeline_mode<synchronous>, transform_indices = @transform_5, window_bounds = array<i64: 1, 32>}, {transform_indices = @transform_6, window_bounds = array<i64: 1, 1, 20, 32>}]} {
    %cst = arith.constant 0.000000e+00 : f32
    %0 = vector.broadcast %cst : f32 to vector<20x32xf32>
    %c0_i32 = arith.constant 0 : i32
    %1 = arith.addi %arg1, %c0_i32 : i32
    %c0 = arith.constant 0 : index
    %2 = arith.index_cast %1 : i32 to index
    %c0_0 = arith.constant 0 : index
    %c0_1 = arith.constant 0 : index
    %3 = vector.load %arg2[%c0, %2, %c0_0, %c0_1] : memref<1x22x22x3xf32, #tpu.memory_space<vmem>>, vector<1x1x20x3xf32>
    %4 = vector.shape_cast %3 : vector<1x1x20x3xf32> to vector<20x3xf32>
    %5 = arith.truncf %4 : vector<20x3xf32> to vector<20x3xbf16>
    %c0_2 = arith.constant 0 : index
    %c0_3 = arith.constant 0 : index
    %c0_4 = arith.constant 0 : index
    %6 = vector.load %arg3[%c0_2, %c0_3, %c0_4] : memref<9x3x32xbf16, #tpu.memory_space<vmem>>, vector<1x3x32xbf16>
    %7 = vector.shape_cast %6 : vector<1x3x32xbf16> to vector<3x32xbf16>
    %cst_5 = arith.constant dense<0.000000e+00> : vector<20x32xf32>
    %8 = tpu.matmul %5, %7, %cst_5 {dimension_numbers = #tpu.dot_dimension_numbers<[1], [0], [0], [1], [0, 0, 1, 1], [], []>} : vector<20x3xbf16>, vector<3x32xbf16>, vector<20x32xf32> -> vector<20x32xf32>
    %9 = arith.addf %0, %8 : vector<20x32xf32>
    %c0_i32_6 = arith.constant 0 : i32
    %10 = arith.addi %arg1, %c0_i32_6 : i32
    %c0_7 = arith.constant 0 : index
    %11 = arith.index_cast %10 : i32 to index
    %c1 = arith.constant 1 : index
    %c0_8 = arith.constant 0 : index
    %12 = vector.load %arg2[%c0_7, %11, %c1, %c0_8] : memref<1x22x22x3xf32, #tpu.memory_space<vmem>>, vector<1x1x20x3xf32>
    %13 = vector.shape_cast %12 : vector<1x1x20x3xf32> to vector<20x3xf32>
    %14 = arith.truncf %13 : vector<20x3xf32> to vector<20x3xbf16>
    %c1_9 = arith.constant 1 : index
    %c0_10 = arith.constant 0 : index
    %c0_11 = arith.constant 0 : index
    %15 = vector.load %arg3[%c1_9, %c0_10, %c0_11] : memref<9x3x32xbf16, #tpu.memory_space<vmem>>, vector<1x3x32xbf16>
    %16 = vector.shape_cast %15 : vector<1x3x32xbf16> to vector<3x32xbf16>
    %cst_12 = arith.constant dense<0.000000e+00> : vector<20x32xf32>
    %17 = tpu.matmul %14, %16, %cst_12 {dimension_numbers = #tpu.dot_dimension_numbers<[1], [0], [0], [1], [0, 0, 1, 1], [], []>} : vector<20x3xbf16>, vector<3x32xbf16>, vector<20x32xf32> -> vector<20x32xf32>
    %18 = arith.addf %9, %17 : vector<20x32xf32>
    %c0_i32_13 = arith.constant 0 : i32
    %19 = arith.addi %arg1, %c0_i32_13 : i32
    %c0_14 = arith.constant 0 : index
    %20 = arith.index_cast %19 : i32 to index
    %c2 = arith.constant 2 : index
    %c0_15 = arith.constant 0 : index
    %21 = vector.load %arg2[%c0_14, %20, %c2, %c0_15] : memref<1x22x22x3xf32, #tpu.memory_space<vmem>>, vector<1x1x20x3xf32>
    %22 = vector.shape_cast %21 : vector<1x1x20x3xf32> to vector<20x3xf32>
    %23 = arith.truncf %22 : vector<20x3xf32> to vector<20x3xbf16>
    %c2_16 = arith.constant 2 : index
    %c0_17 = arith.constant 0 : index
    %c0_18 = arith.constant 0 : index
    %24 = vector.load %arg3[%c2_16, %c0_17, %c0_18] : memref<9x3x32xbf16, #tpu.memory_space<vmem>>, vector<1x3x32xbf16>
    %25 = vector.shape_cast %24 : vector<1x3x32xbf16> to vector<3x32xbf16>
    %cst_19 = arith.constant dense<0.000000e+00> : vector<20x32xf32>
    %26 = tpu.matmul %23, %25, %cst_19 {dimension_numbers = #tpu.dot_dimension_numbers<[1], [0], [0], [1], [0, 0, 1, 1], [], []>} : vector<20x3xbf16>, vector<3x32xbf16>, vector<20x32xf32> -> vector<20x32xf32>
    %27 = arith.addf %18, %26 : vector<20x32xf32>
    %c1_i32 = arith.constant 1 : i32
    %28 = arith.addi %arg1, %c1_i32 : i32
    %c0_20 = arith.constant 0 : index
    %29 = arith.index_cast %28 : i32 to index
    %c0_21 = arith.constant 0 : index
    %c0_22 = arith.constant 0 : index
    %30 = vector.load %arg2[%c0_20, %29, %c0_21, %c0_22] : memref<1x22x22x3xf32, #tpu.memory_space<vmem>>, vector<1x1x20x3xf32>
    %31 = vector.shape_cast %30 : vector<1x1x20x3xf32> to vector<20x3xf32>
    %32 = arith.truncf %31 : vector<20x3xf32> to vector<20x3xbf16>
    %c3 = arith.constant 3 : index
    %c0_23 = arith.constant 0 : index
    %c0_24 = arith.constant 0 : index
    %33 = vector.load %arg3[%c3, %c0_23, %c0_24] : memref<9x3x32xbf16, #tpu.memory_space<vmem>>, vector<1x3x32xbf16>
    %34 = vector.shape_cast %33 : vector<1x3x32xbf16> to vector<3x32xbf16>
    %cst_25 = arith.constant dense<0.000000e+00> : vector<20x32xf32>
    %35 = tpu.matmul %32, %34, %cst_25 {dimension_numbers = #tpu.dot_dimension_numbers<[1], [0], [0], [1], [0, 0, 1, 1], [], []>} : vector<20x3xbf16>, vector<3x32xbf16>, vector<20x32xf32> -> vector<20x32xf32>
    %36 = arith.addf %27, %35 : vector<20x32xf32>
    %c1_i32_26 = arith.constant 1 : i32
    %37 = arith.addi %arg1, %c1_i32_26 : i32
    %c0_27 = arith.constant 0 : index
    %38 = arith.index_cast %37 : i32 to index
    %c1_28 = arith.constant 1 : index
    %c0_29 = arith.constant 0 : index
    %39 = vector.load %arg2[%c0_27, %38, %c1_28, %c0_29] : memref<1x22x22x3xf32, #tpu.memory_space<vmem>>, vector<1x1x20x3xf32>
    %40 = vector.shape_cast %39 : vector<1x1x20x3xf32> to vector<20x3xf32>
    %41 = arith.truncf %40 : vector<20x3xf32> to vector<20x3xbf16>
    %c4 = arith.constant 4 : index
    %c0_30 = arith.constant 0 : index
    %c0_31 = arith.constant 0 : index
    %42 = vector.load %arg3[%c4, %c0_30, %c0_31] : memref<9x3x32xbf16, #tpu.memory_space<vmem>>, vector<1x3x32xbf16>
    %43 = vector.shape_cast %42 : vector<1x3x32xbf16> to vector<3x32xbf16>
    %cst_32 = arith.constant dense<0.000000e+00> : vector<20x32xf32>
    %44 = tpu.matmul %41, %43, %cst_32 {dimension_numbers = #tpu.dot_dimension_numbers<[1], [0], [0], [1], [0, 0, 1, 1], [], []>} : vector<20x3xbf16>, vector<3x32xbf16>, vector<20x32xf32> -> vector<20x32xf32>
    %45 = arith.addf %36, %44 : vector<20x32xf32>
    %c1_i32_33 = arith.constant 1 : i32
    %46 = arith.addi %arg1, %c1_i32_33 : i32
    %c0_34 = arith.constant 0 : index
    %47 = arith.index_cast %46 : i32 to index
    %c2_35 = arith.constant 2 : index
    %c0_36 = arith.constant 0 : index
    %48 = vector.load %arg2[%c0_34, %47, %c2_35, %c0_36] : memref<1x22x22x3xf32, #tpu.memory_space<vmem>>, vector<1x1x20x3xf32>
    %49 = vector.shape_cast %48 : vector<1x1x20x3xf32> to vector<20x3xf32>
    %50 = arith.truncf %49 : vector<20x3xf32> to vector<20x3xbf16>
    %c5 = arith.constant 5 : index
    %c0_37 = arith.constant 0 : index
    %c0_38 = arith.constant 0 : index
    %51 = vector.load %arg3[%c5, %c0_37, %c0_38] : memref<9x3x32xbf16, #tpu.memory_space<vmem>>, vector<1x3x32xbf16>
    %52 = vector.shape_cast %51 : vector<1x3x32xbf16> to vector<3x32xbf16>
    %cst_39 = arith.constant dense<0.000000e+00> : vector<20x32xf32>
    %53 = tpu.matmul %50, %52, %cst_39 {dimension_numbers = #tpu.dot_dimension_numbers<[1], [0], [0], [1], [0, 0, 1, 1], [], []>} : vector<20x3xbf16>, vector<3x32xbf16>, vector<20x32xf32> -> vector<20x32xf32>
    %54 = arith.addf %45, %53 : vector<20x32xf32>
    %c2_i32 = arith.constant 2 : i32
    %55 = arith.addi %arg1, %c2_i32 : i32
    %c0_40 = arith.constant 0 : index
    %56 = arith.index_cast %55 : i32 to index
    %c0_41 = arith.constant 0 : index
    %c0_42 = arith.constant 0 : index
    %57 = vector.load %arg2[%c0_40, %56, %c0_41, %c0_42] : memref<1x22x22x3xf32, #tpu.memory_space<vmem>>, vector<1x1x20x3xf32>
    %58 = vector.shape_cast %57 : vector<1x1x20x3xf32> to vector<20x3xf32>
    %59 = arith.truncf %58 : vector<20x3xf32> to vector<20x3xbf16>
    %c6 = arith.constant 6 : index
    %c0_43 = arith.constant 0 : index
    %c0_44 = arith.constant 0 : index
    %60 = vector.load %arg3[%c6, %c0_43, %c0_44] : memref<9x3x32xbf16, #tpu.memory_space<vmem>>, vector<1x3x32xbf16>
    %61 = vector.shape_cast %60 : vector<1x3x32xbf16> to vector<3x32xbf16>
    %cst_45 = arith.constant dense<0.000000e+00> : vector<20x32xf32>
    %62 = tpu.matmul %59, %61, %cst_45 {dimension_numbers = #tpu.dot_dimension_numbers<[1], [0], [0], [1], [0, 0, 1, 1], [], []>} : vector<20x3xbf16>, vector<3x32xbf16>, vector<20x32xf32> -> vector<20x32xf32>
    %63 = arith.addf %54, %62 : vector<20x32xf32>
    %c2_i32_46 = arith.constant 2 : i32
    %64 = arith.addi %arg1, %c2_i32_46 : i32
    %c0_47 = arith.constant 0 : index
    %65 = arith.index_cast %64 : i32 to index
    %c1_48 = arith.constant 1 : index
    %c0_49 = arith.constant 0 : index
    %66 = vector.load %arg2[%c0_47, %65, %c1_48, %c0_49] : memref<1x22x22x3xf32, #tpu.memory_space<vmem>>, vector<1x1x20x3xf32>
    %67 = vector.shape_cast %66 : vector<1x1x20x3xf32> to vector<20x3xf32>
    %68 = arith.truncf %67 : vector<20x3xf32> to vector<20x3xbf16>
    %c7 = arith.constant 7 : index
    %c0_50 = arith.constant 0 : index
    %c0_51 = arith.constant 0 : index
    %69 = vector.load %arg3[%c7, %c0_50, %c0_51] : memref<9x3x32xbf16, #tpu.memory_space<vmem>>, vector<1x3x32xbf16>
    %70 = vector.shape_cast %69 : vector<1x3x32xbf16> to vector<3x32xbf16>
    %cst_52 = arith.constant dense<0.000000e+00> : vector<20x32xf32>
    %71 = tpu.matmul %68, %70, %cst_52 {dimension_numbers = #tpu.dot_dimension_numbers<[1], [0], [0], [1], [0, 0, 1, 1], [], []>} : vector<20x3xbf16>, vector<3x32xbf16>, vector<20x32xf32> -> vector<20x32xf32>
    %72 = arith.addf %63, %71 : vector<20x32xf32>
    %c2_i32_53 = arith.constant 2 : i32
    %73 = arith.addi %arg1, %c2_i32_53 : i32
    %c0_54 = arith.constant 0 : index
    %74 = arith.index_cast %73 : i32 to index
    %c2_55 = arith.constant 2 : index
    %c0_56 = arith.constant 0 : index
    %75 = vector.load %arg2[%c0_54, %74, %c2_55, %c0_56] : memref<1x22x22x3xf32, #tpu.memory_space<vmem>>, vector<1x1x20x3xf32>
    %76 = vector.shape_cast %75 : vector<1x1x20x3xf32> to vector<20x3xf32>
    %77 = arith.truncf %76 : vector<20x3xf32> to vector<20x3xbf16>
    %c8 = arith.constant 8 : index
    %c0_57 = arith.constant 0 : index
    %c0_58 = arith.constant 0 : index
    %78 = vector.load %arg3[%c8, %c0_57, %c0_58] : memref<9x3x32xbf16, #tpu.memory_space<vmem>>, vector<1x3x32xbf16>
    %79 = vector.shape_cast %78 : vector<1x3x32xbf16> to vector<3x32xbf16>
    %cst_59 = arith.constant dense<0.000000e+00> : vector<20x32xf32>
    %80 = tpu.matmul %77, %79, %cst_59 {dimension_numbers = #tpu.dot_dimension_numbers<[1], [0], [0], [1], [0, 0, 1, 1], [], []>} : vector<20x3xbf16>, vector<3x32xbf16>, vector<20x32xf32> -> vector<20x32xf32>
    %81 = arith.addf %72, %80 : vector<20x32xf32>
    %c0_60 = arith.constant 0 : index
    %c0_61 = arith.constant 0 : index
    %82 = vector.load %arg4[%c0_60, %c0_61] : memref<1x32xf32, #tpu.memory_space<vmem>>, vector<1x32xf32>
    %83 = vector.broadcast %82 : vector<1x32xf32> to vector<20x32xf32>
    %84 = arith.addf %81, %83 : vector<20x32xf32>
    %c0_62 = arith.constant 0 : index
    %c0_63 = arith.constant 0 : index
    %85 = vector.load %arg5[%c0_62, %c0_63] : memref<32x32xf32, #tpu.memory_space<vmem>>, vector<32x32xf32>
    %cst_64 = arith.constant dense<0.000000e+00> : vector<20x32xf32>
    %86 = tpu.matmul %84, %85, %cst_64 {dimension_numbers = #tpu.dot_dimension_numbers<[1], [0], [0], [1], [0, 0, 1, 1], [], []>} : vector<20x32xf32>, vector<32x32xf32>, vector<20x32xf32> -> vector<20x32xf32>
    %87 = arith.subf %84, %86 : vector<20x32xf32>
    %88 = arith.mulf %87, %87 : vector<20x32xf32>
    %c0_65 = arith.constant 0 : index
    %c0_66 = arith.constant 0 : index
    %89 = vector.load %arg5[%c0_65, %c0_66] : memref<32x32xf32, #tpu.memory_space<vmem>>, vector<32x32xf32>
    %cst_67 = arith.constant dense<0.000000e+00> : vector<20x32xf32>
    %90 = tpu.matmul %88, %89, %cst_67 {dimension_numbers = #tpu.dot_dimension_numbers<[1], [0], [0], [1], [0, 0, 1, 1], [], []>} : vector<20x32xf32>, vector<32x32xf32>, vector<20x32xf32> -> vector<20x32xf32>
    %cst_68 = arith.constant 9.99999974E-6 : f32
    %91 = vector.broadcast %cst_68 : f32 to vector<20x32xf32>
    %92 = arith.addf %90, %91 : vector<20x32xf32>
    %93 = math.rsqrt %92 : vector<20x32xf32>
    %94 = arith.mulf %87, %93 : vector<20x32xf32>
    %c0_69 = arith.constant 0 : index
    %c0_70 = arith.constant 0 : index
    %95 = vector.load %arg6[%c0_69, %c0_70] : memref<1x32xf32, #tpu.memory_space<vmem>>, vector<1x32xf32>
    %96 = vector.broadcast %95 : vector<1x32xf32> to vector<20x32xf32>
    %97 = arith.mulf %94, %96 : vector<20x32xf32>
    %c0_71 = arith.constant 0 : index
    %c0_72 = arith.constant 0 : index
    %98 = vector.load %arg7[%c0_71, %c0_72] : memref<1x32xf32, #tpu.memory_space<vmem>>, vector<1x32xf32>
    %99 = vector.broadcast %98 : vector<1x32xf32> to vector<20x32xf32>
    %100 = arith.addf %97, %99 : vector<20x32xf32>
    %cst_73 = arith.constant 0.000000e+00 : f32
    %101 = vector.broadcast %cst_73 : f32 to vector<20x32xf32>
    %102 = arith.cmpf oge, %100, %101 : vector<20x32xf32>
    %cst_74 = arith.constant 0.00999999977 : f32
    %103 = vector.broadcast %cst_74 : f32 to vector<20x32xf32>
    %104 = arith.mulf %103, %100 : vector<20x32xf32>
    %105 = arith.select %102, %100, %104 : vector<20x32xi1>, vector<20x32xf32>
    %c0_75 = arith.constant 0 : index
    %c0_76 = arith.constant 0 : index
    %c0_77 = arith.constant 0 : index
    %c0_78 = arith.constant 0 : index
    %106 = vector.load %arg8[%c0_75, %c0_76, %c0_77, %c0_78] : memref<1x1x20x32xf32, #tpu.memory_space<vmem>>, vector<1x1x20x32xf32>
    %107 = vector.shape_cast %106 : vector<1x1x20x32xf32> to vector<20x32xf32>
    %108 = vector.shape_cast %105 : vector<20x32xf32> to vector<1x1x20x32xf32>
    tpu.vector_store %arg8[%c0_75, %c0_76, %c0_77, %c0_78], %108 {strides = array<i32>} : memref<1x1x20x32xf32, #tpu.memory_space<vmem>>, vector<1x1x20x32xf32>,
    return
  }
  func.func @transform_0(%arg0: i32, %arg1: i32) -> (i32, i32, i32, i32) {
    %c0_i32 = arith.constant 0 : i32
    %c0_i32_0 = arith.constant 0 : i32
    %c0_i32_1 = arith.constant 0 : i32
    %c0_i32_2 = arith.constant 0 : i32
    return %arg0, %c0_i32, %c0_i32_0, %c0_i32_1 : i32, i32, i32, i32
  }
  func.func @transform_1(%arg0: i32, %arg1: i32) -> (i32, i32, i32) {
    %c0_i32 = arith.constant 0 : i32
    %c0_i32_0 = arith.constant 0 : i32
    %c0_i32_1 = arith.constant 0 : i32
    %c0_i32_2 = arith.constant 0 : i32
    return %c0_i32, %c0_i32_0, %c0_i32_1 : i32, i32, i32
  }
  func.func @transform_2(%arg0: i32, %arg1: i32) -> (i32, i32) {
    %c0_i32 = arith.constant 0 : i32
    %c0_i32_0 = arith.constant 0 : i32
    %c0_i32_1 = arith.constant 0 : i32
    return %c0_i32, %c0_i32_0 : i32, i32
  }
  func.func @transform_3(%arg0: i32, %arg1: i32) -> (i32, i32) {
    %c0_i32 = arith.constant 0 : i32
    %c0_i32_0 = arith.constant 0 : i32
    %c0_i32_1 = arith.constant 0 : i32
    return %c0_i32, %c0_i32_0 : i32, i32
  }
  func.func @transform_4(%arg0: i32, %arg1: i32) -> (i32, i32) {
    %c0_i32 = arith.constant 0 : i32
    %c0_i32_0 = arith.constant 0 : i32
    %c0_i32_1 = arith.constant 0 : i32
    return %c0_i32, %c0_i32_0 : i32, i32
  }
  func.func @transform_5(%arg0: i32, %arg1: i32) -> (i32, i32) {
    %c0_i32 = arith.constant 0 : i32
    %c0_i32_0 = arith.constant 0 : i32
    %c0_i32_1 = arith.constant 0 : i32
    return %c0_i32, %c0_i32_0 : i32, i32
  }
  func.func @transform_6(%arg0: i32, %arg1: i32) -> (i32, i32, i32, i32) {
    %c0_i32 = arith.constant 0 : i32
    %c0_i32_0 = arith.constant 0 : i32
    %c0_i32_1 = arith.constant 0 : i32
    return %arg0, %arg1, %c0_i32, %c0_i32_0 : i32, i32, i32, i32
  }
}

module attributes {stable_mosaic.version = 11 : i64} {
  func.func @_pool_kernel(%arg0: i32, %arg1: memref<1x4x2x4x64xf32, #tpu.memory_space<vmem>>, %arg2: memref<1x4x4x32xf32, #tpu.memory_space<vmem>>) attributes {dimension_semantics = [#tpu.dimension_semantics<parallel>], iteration_bounds = array<i64: 2>, scalar_prefetch = 0 : i64, scratch_operands = 0 : i64, tpu.core_type = #tpu.core_type<tc>, window_params = [{transform_indices = @transform_0, window_bounds = array<i64: 1, 4, 2, 4, 64>}, {transform_indices = @transform_1, window_bounds = array<i64: 1, 4, 4, 32>}]} {
    %c0 = arith.constant 0 : index
    %c0_0 = arith.constant 0 : index
    %c0_1 = arith.constant 0 : index
    %c0_2 = arith.constant 0 : index
    %c0_3 = arith.constant 0 : index
    %0 = vector.load %arg1[%c0, %c0_0, %c0_1, %c0_2, %c0_3] : memref<1x4x2x4x64xf32, #tpu.memory_space<vmem>>, vector<1x4x2x4x64xf32>
    %1 = vector.shape_cast %0 : vector<1x4x2x4x64xf32> to vector<4x2x4x64xf32>
    %2 = vector.extract_strided_slice %1 {offsets = [0, 0, 0, 0], sizes = [4, 1, 4, 64], strides = [1, 1, 1, 1]} : vector<4x2x4x64xf32> to vector<4x1x4x64xf32>
    %3 = vector.shape_cast %2 : vector<4x1x4x64xf32> to vector<4x4x64xf32>
    %4 = vector.extract_strided_slice %1 {offsets = [0, 1, 0, 0], sizes = [4, 1, 4, 64], strides = [1, 1, 1, 1]} : vector<4x2x4x64xf32> to vector<4x1x4x64xf32>
    %5 = vector.shape_cast %4 : vector<4x1x4x64xf32> to vector<4x4x64xf32>
    %6 = arith.maximumf %3, %5 : vector<4x4x64xf32>
    %7 = vector.extract_strided_slice %6 {offsets = [0, 0, 0], sizes = [4, 4, 32], strides = [1, 1, 1]} : vector<4x4x64xf32> to vector<4x4x32xf32>
    %8 = vector.extract_strided_slice %6 {offsets = [0, 0, 32], sizes = [4, 4, 32], strides = [1, 1, 1]} : vector<4x4x64xf32> to vector<4x4x32xf32>
    %9 = arith.maximumf %7, %8 : vector<4x4x32xf32>
    %c0_4 = arith.constant 0 : index
    %c0_5 = arith.constant 0 : index
    %c0_6 = arith.constant 0 : index
    %c0_7 = arith.constant 0 : index
    %10 = vector.load %arg2[%c0_4, %c0_5, %c0_6, %c0_7] : memref<1x4x4x32xf32, #tpu.memory_space<vmem>>, vector<1x4x4x32xf32>
    %11 = vector.shape_cast %10 : vector<1x4x4x32xf32> to vector<4x4x32xf32>
    %12 = vector.shape_cast %9 : vector<4x4x32xf32> to vector<1x4x4x32xf32>
    tpu.vector_store %arg2[%c0_4, %c0_5, %c0_6, %c0_7], %12 {strides = array<i32>} : memref<1x4x4x32xf32, #tpu.memory_space<vmem>>, vector<1x4x4x32xf32>,
    return
  }
  func.func @transform_0(%arg0: i32) -> (i32, i32, i32, i32, i32) {
    %c0_i32 = arith.constant 0 : i32
    %c0_i32_0 = arith.constant 0 : i32
    %c0_i32_1 = arith.constant 0 : i32
    %c0_i32_2 = arith.constant 0 : i32
    %c0_i32_3 = arith.constant 0 : i32
    return %arg0, %c0_i32, %c0_i32_0, %c0_i32_1, %c0_i32_2 : i32, i32, i32, i32, i32
  }
  func.func @transform_1(%arg0: i32) -> (i32, i32, i32, i32) {
    %c0_i32 = arith.constant 0 : i32
    %c0_i32_0 = arith.constant 0 : i32
    %c0_i32_1 = arith.constant 0 : i32
    %c0_i32_2 = arith.constant 0 : i32
    return %arg0, %c0_i32, %c0_i32_0, %c0_i32_1 : i32, i32, i32, i32
  }
}

module attributes {stable_mosaic.version = 11 : i64} {
  func.func @_convnext_kernel(%arg0: i32, %arg1: i32, %arg2: memref<1x10x10x32xf32, #tpu.memory_space<vmem>>, %arg3: memref<9x32x32xbf16, #tpu.memory_space<vmem>>, %arg4: memref<1x32xf32, #tpu.memory_space<vmem>>, %arg5: memref<32x32xf32, #tpu.memory_space<vmem>>, %arg6: memref<1x32xf32, #tpu.memory_space<vmem>>, %arg7: memref<1x32xf32, #tpu.memory_space<vmem>>, %arg8: memref<32x128xbf16, #tpu.memory_space<vmem>>, %arg9: memref<1x128xf32, #tpu.memory_space<vmem>>, %arg10: memref<128x32xbf16, #tpu.memory_space<vmem>>, %arg11: memref<1x32xf32, #tpu.memory_space<vmem>>, %arg12: memref<1x1x8x32xf32, #tpu.memory_space<vmem>>) attributes {dimension_semantics = [#tpu.dimension_semantics<parallel>, #tpu.dimension_semantics<arbitrary>], iteration_bounds = array<i64: 2, 8>, scalar_prefetch = 0 : i64, scratch_operands = 0 : i64, tpu.core_type = #tpu.core_type<tc>, window_params = [{transform_indices = @transform_0, window_bounds = array<i64: 1, 10, 10, 32>}, {pipeline_mode = #tpu.pipeline_mode<synchronous>, transform_indices = @transform_1, window_bounds = array<i64: 9, 32, 32>}, {pipeline_mode = #tpu.pipeline_mode<synchronous>, transform_indices = @transform_2, window_bounds = array<i64: 1, 32>}, {pipeline_mode = #tpu.pipeline_mode<synchronous>, transform_indices = @transform_3, window_bounds = array<i64: 32, 32>}, {pipeline_mode = #tpu.pipeline_mode<synchronous>, transform_indices = @transform_4, window_bounds = array<i64: 1, 32>}, {pipeline_mode = #tpu.pipeline_mode<synchronous>, transform_indices = @transform_5, window_bounds = array<i64: 1, 32>}, {pipeline_mode = #tpu.pipeline_mode<synchronous>, transform_indices = @transform_6, window_bounds = array<i64: 32, 128>}, {pipeline_mode = #tpu.pipeline_mode<synchronous>, transform_indices = @transform_7, window_bounds = array<i64: 1, 128>}, {pipeline_mode = #tpu.pipeline_mode<synchronous>, transform_indices = @transform_8, window_bounds = array<i64: 128, 32>}, {pipeline_mode = #tpu.pipeline_mode<synchronous>, transform_indices = @transform_9, window_bounds = array<i64: 1, 32>}, {transform_indices = @transform_10, window_bounds = array<i64: 1, 1, 8, 32>}]} {
    %cst = arith.constant 0.000000e+00 : f32
    %0 = vector.broadcast %cst : f32 to vector<8x32xf32>
    %c0_i32 = arith.constant 0 : i32
    %1 = arith.addi %arg1, %c0_i32 : i32
    %c0 = arith.constant 0 : index
    %2 = arith.index_cast %1 : i32 to index
    %c0_0 = arith.constant 0 : index
    %c0_1 = arith.constant 0 : index
    %3 = vector.load %arg2[%c0, %2, %c0_0, %c0_1] : memref<1x10x10x32xf32, #tpu.memory_space<vmem>>, vector<1x1x8x32xf32>
    %4 = vector.shape_cast %3 : vector<1x1x8x32xf32> to vector<8x32xf32>
    %5 = arith.truncf %4 : vector<8x32xf32> to vector<8x32xbf16>
    %c0_2 = arith.constant 0 : index
    %c0_3 = arith.constant 0 : index
    %c0_4 = arith.constant 0 : index
    %6 = vector.load %arg3[%c0_2, %c0_3, %c0_4] : memref<9x32x32xbf16, #tpu.memory_space<vmem>>, vector<1x32x32xbf16>
    %7 = vector.shape_cast %6 : vector<1x32x32xbf16> to vector<32x32xbf16>
    %cst_5 = arith.constant dense<0.000000e+00> : vector<8x32xf32>
    %8 = tpu.matmul %5, %7, %cst_5 {dimension_numbers = #tpu.dot_dimension_numbers<[1], [0], [0], [1], [0, 0, 1, 1], [], []>} : vector<8x32xbf16>, vector<32x32xbf16>, vector<8x32xf32> -> vector<8x32xf32>
    %9 = arith.addf %0, %8 : vector<8x32xf32>
    %c0_i32_6 = arith.constant 0 : i32
    %10 = arith.addi %arg1, %c0_i32_6 : i32
    %c0_7 = arith.constant 0 : index
    %11 = arith.index_cast %10 : i32 to index
    %c1 = arith.constant 1 : index
    %c0_8 = arith.constant 0 : index
    %12 = vector.load %arg2[%c0_7, %11, %c1, %c0_8] : memref<1x10x10x32xf32, #tpu.memory_space<vmem>>, vector<1x1x8x32xf32>
    %13 = vector.shape_cast %12 : vector<1x1x8x32xf32> to vector<8x32xf32>
    %14 = arith.truncf %13 : vector<8x32xf32> to vector<8x32xbf16>
    %c1_9 = arith.constant 1 : index
    %c0_10 = arith.constant 0 : index
    %c0_11 = arith.constant 0 : index
    %15 = vector.load %arg3[%c1_9, %c0_10, %c0_11] : memref<9x32x32xbf16, #tpu.memory_space<vmem>>, vector<1x32x32xbf16>
    %16 = vector.shape_cast %15 : vector<1x32x32xbf16> to vector<32x32xbf16>
    %cst_12 = arith.constant dense<0.000000e+00> : vector<8x32xf32>
    %17 = tpu.matmul %14, %16, %cst_12 {dimension_numbers = #tpu.dot_dimension_numbers<[1], [0], [0], [1], [0, 0, 1, 1], [], []>} : vector<8x32xbf16>, vector<32x32xbf16>, vector<8x32xf32> -> vector<8x32xf32>
    %18 = arith.addf %9, %17 : vector<8x32xf32>
    %c0_i32_13 = arith.constant 0 : i32
    %19 = arith.addi %arg1, %c0_i32_13 : i32
    %c0_14 = arith.constant 0 : index
    %20 = arith.index_cast %19 : i32 to index
    %c2 = arith.constant 2 : index
    %c0_15 = arith.constant 0 : index
    %21 = vector.load %arg2[%c0_14, %20, %c2, %c0_15] : memref<1x10x10x32xf32, #tpu.memory_space<vmem>>, vector<1x1x8x32xf32>
    %22 = vector.shape_cast %21 : vector<1x1x8x32xf32> to vector<8x32xf32>
    %23 = arith.truncf %22 : vector<8x32xf32> to vector<8x32xbf16>
    %c2_16 = arith.constant 2 : index
    %c0_17 = arith.constant 0 : index
    %c0_18 = arith.constant 0 : index
    %24 = vector.load %arg3[%c2_16, %c0_17, %c0_18] : memref<9x32x32xbf16, #tpu.memory_space<vmem>>, vector<1x32x32xbf16>
    %25 = vector.shape_cast %24 : vector<1x32x32xbf16> to vector<32x32xbf16>
    %cst_19 = arith.constant dense<0.000000e+00> : vector<8x32xf32>
    %26 = tpu.matmul %23, %25, %cst_19 {dimension_numbers = #tpu.dot_dimension_numbers<[1], [0], [0], [1], [0, 0, 1, 1], [], []>} : vector<8x32xbf16>, vector<32x32xbf16>, vector<8x32xf32> -> vector<8x32xf32>
    %27 = arith.addf %18, %26 : vector<8x32xf32>
    %c1_i32 = arith.constant 1 : i32
    %28 = arith.addi %arg1, %c1_i32 : i32
    %c0_20 = arith.constant 0 : index
    %29 = arith.index_cast %28 : i32 to index
    %c0_21 = arith.constant 0 : index
    %c0_22 = arith.constant 0 : index
    %30 = vector.load %arg2[%c0_20, %29, %c0_21, %c0_22] : memref<1x10x10x32xf32, #tpu.memory_space<vmem>>, vector<1x1x8x32xf32>
    %31 = vector.shape_cast %30 : vector<1x1x8x32xf32> to vector<8x32xf32>
    %32 = arith.truncf %31 : vector<8x32xf32> to vector<8x32xbf16>
    %c3 = arith.constant 3 : index
    %c0_23 = arith.constant 0 : index
    %c0_24 = arith.constant 0 : index
    %33 = vector.load %arg3[%c3, %c0_23, %c0_24] : memref<9x32x32xbf16, #tpu.memory_space<vmem>>, vector<1x32x32xbf16>
    %34 = vector.shape_cast %33 : vector<1x32x32xbf16> to vector<32x32xbf16>
    %cst_25 = arith.constant dense<0.000000e+00> : vector<8x32xf32>
    %35 = tpu.matmul %32, %34, %cst_25 {dimension_numbers = #tpu.dot_dimension_numbers<[1], [0], [0], [1], [0, 0, 1, 1], [], []>} : vector<8x32xbf16>, vector<32x32xbf16>, vector<8x32xf32> -> vector<8x32xf32>
    %36 = arith.addf %27, %35 : vector<8x32xf32>
    %c1_i32_26 = arith.constant 1 : i32
    %37 = arith.addi %arg1, %c1_i32_26 : i32
    %c0_27 = arith.constant 0 : index
    %38 = arith.index_cast %37 : i32 to index
    %c1_28 = arith.constant 1 : index
    %c0_29 = arith.constant 0 : index
    %39 = vector.load %arg2[%c0_27, %38, %c1_28, %c0_29] : memref<1x10x10x32xf32, #tpu.memory_space<vmem>>, vector<1x1x8x32xf32>
    %40 = vector.shape_cast %39 : vector<1x1x8x32xf32> to vector<8x32xf32>
    %41 = arith.truncf %40 : vector<8x32xf32> to vector<8x32xbf16>
    %c4 = arith.constant 4 : index
    %c0_30 = arith.constant 0 : index
    %c0_31 = arith.constant 0 : index
    %42 = vector.load %arg3[%c4, %c0_30, %c0_31] : memref<9x32x32xbf16, #tpu.memory_space<vmem>>, vector<1x32x32xbf16>
    %43 = vector.shape_cast %42 : vector<1x32x32xbf16> to vector<32x32xbf16>
    %cst_32 = arith.constant dense<0.000000e+00> : vector<8x32xf32>
    %44 = tpu.matmul %41, %43, %cst_32 {dimension_numbers = #tpu.dot_dimension_numbers<[1], [0], [0], [1], [0, 0, 1, 1], [], []>} : vector<8x32xbf16>, vector<32x32xbf16>, vector<8x32xf32> -> vector<8x32xf32>
    %45 = arith.addf %36, %44 : vector<8x32xf32>
    %c1_i32_33 = arith.constant 1 : i32
    %46 = arith.addi %arg1, %c1_i32_33 : i32
    %c0_34 = arith.constant 0 : index
    %47 = arith.index_cast %46 : i32 to index
    %c2_35 = arith.constant 2 : index
    %c0_36 = arith.constant 0 : index
    %48 = vector.load %arg2[%c0_34, %47, %c2_35, %c0_36] : memref<1x10x10x32xf32, #tpu.memory_space<vmem>>, vector<1x1x8x32xf32>
    %49 = vector.shape_cast %48 : vector<1x1x8x32xf32> to vector<8x32xf32>
    %50 = arith.truncf %49 : vector<8x32xf32> to vector<8x32xbf16>
    %c5 = arith.constant 5 : index
    %c0_37 = arith.constant 0 : index
    %c0_38 = arith.constant 0 : index
    %51 = vector.load %arg3[%c5, %c0_37, %c0_38] : memref<9x32x32xbf16, #tpu.memory_space<vmem>>, vector<1x32x32xbf16>
    %52 = vector.shape_cast %51 : vector<1x32x32xbf16> to vector<32x32xbf16>
    %cst_39 = arith.constant dense<0.000000e+00> : vector<8x32xf32>
    %53 = tpu.matmul %50, %52, %cst_39 {dimension_numbers = #tpu.dot_dimension_numbers<[1], [0], [0], [1], [0, 0, 1, 1], [], []>} : vector<8x32xbf16>, vector<32x32xbf16>, vector<8x32xf32> -> vector<8x32xf32>
    %54 = arith.addf %45, %53 : vector<8x32xf32>
    %c2_i32 = arith.constant 2 : i32
    %55 = arith.addi %arg1, %c2_i32 : i32
    %c0_40 = arith.constant 0 : index
    %56 = arith.index_cast %55 : i32 to index
    %c0_41 = arith.constant 0 : index
    %c0_42 = arith.constant 0 : index
    %57 = vector.load %arg2[%c0_40, %56, %c0_41, %c0_42] : memref<1x10x10x32xf32, #tpu.memory_space<vmem>>, vector<1x1x8x32xf32>
    %58 = vector.shape_cast %57 : vector<1x1x8x32xf32> to vector<8x32xf32>
    %59 = arith.truncf %58 : vector<8x32xf32> to vector<8x32xbf16>
    %c6 = arith.constant 6 : index
    %c0_43 = arith.constant 0 : index
    %c0_44 = arith.constant 0 : index
    %60 = vector.load %arg3[%c6, %c0_43, %c0_44] : memref<9x32x32xbf16, #tpu.memory_space<vmem>>, vector<1x32x32xbf16>
    %61 = vector.shape_cast %60 : vector<1x32x32xbf16> to vector<32x32xbf16>
    %cst_45 = arith.constant dense<0.000000e+00> : vector<8x32xf32>
    %62 = tpu.matmul %59, %61, %cst_45 {dimension_numbers = #tpu.dot_dimension_numbers<[1], [0], [0], [1], [0, 0, 1, 1], [], []>} : vector<8x32xbf16>, vector<32x32xbf16>, vector<8x32xf32> -> vector<8x32xf32>
    %63 = arith.addf %54, %62 : vector<8x32xf32>
    %c2_i32_46 = arith.constant 2 : i32
    %64 = arith.addi %arg1, %c2_i32_46 : i32
    %c0_47 = arith.constant 0 : index
    %65 = arith.index_cast %64 : i32 to index
    %c1_48 = arith.constant 1 : index
    %c0_49 = arith.constant 0 : index
    %66 = vector.load %arg2[%c0_47, %65, %c1_48, %c0_49] : memref<1x10x10x32xf32, #tpu.memory_space<vmem>>, vector<1x1x8x32xf32>
    %67 = vector.shape_cast %66 : vector<1x1x8x32xf32> to vector<8x32xf32>
    %68 = arith.truncf %67 : vector<8x32xf32> to vector<8x32xbf16>
    %c7 = arith.constant 7 : index
    %c0_50 = arith.constant 0 : index
    %c0_51 = arith.constant 0 : index
    %69 = vector.load %arg3[%c7, %c0_50, %c0_51] : memref<9x32x32xbf16, #tpu.memory_space<vmem>>, vector<1x32x32xbf16>
    %70 = vector.shape_cast %69 : vector<1x32x32xbf16> to vector<32x32xbf16>
    %cst_52 = arith.constant dense<0.000000e+00> : vector<8x32xf32>
    %71 = tpu.matmul %68, %70, %cst_52 {dimension_numbers = #tpu.dot_dimension_numbers<[1], [0], [0], [1], [0, 0, 1, 1], [], []>} : vector<8x32xbf16>, vector<32x32xbf16>, vector<8x32xf32> -> vector<8x32xf32>
    %72 = arith.addf %63, %71 : vector<8x32xf32>
    %c2_i32_53 = arith.constant 2 : i32
    %73 = arith.addi %arg1, %c2_i32_53 : i32
    %c0_54 = arith.constant 0 : index
    %74 = arith.index_cast %73 : i32 to index
    %c2_55 = arith.constant 2 : index
    %c0_56 = arith.constant 0 : index
    %75 = vector.load %arg2[%c0_54, %74, %c2_55, %c0_56] : memref<1x10x10x32xf32, #tpu.memory_space<vmem>>, vector<1x1x8x32xf32>
    %76 = vector.shape_cast %75 : vector<1x1x8x32xf32> to vector<8x32xf32>
    %77 = arith.truncf %76 : vector<8x32xf32> to vector<8x32xbf16>
    %c8 = arith.constant 8 : index
    %c0_57 = arith.constant 0 : index
    %c0_58 = arith.constant 0 : index
    %78 = vector.load %arg3[%c8, %c0_57, %c0_58] : memref<9x32x32xbf16, #tpu.memory_space<vmem>>, vector<1x32x32xbf16>
    %79 = vector.shape_cast %78 : vector<1x32x32xbf16> to vector<32x32xbf16>
    %cst_59 = arith.constant dense<0.000000e+00> : vector<8x32xf32>
    %80 = tpu.matmul %77, %79, %cst_59 {dimension_numbers = #tpu.dot_dimension_numbers<[1], [0], [0], [1], [0, 0, 1, 1], [], []>} : vector<8x32xbf16>, vector<32x32xbf16>, vector<8x32xf32> -> vector<8x32xf32>
    %81 = arith.addf %72, %80 : vector<8x32xf32>
    %c0_60 = arith.constant 0 : index
    %c0_61 = arith.constant 0 : index
    %82 = vector.load %arg4[%c0_60, %c0_61] : memref<1x32xf32, #tpu.memory_space<vmem>>, vector<1x32xf32>
    %83 = vector.broadcast %82 : vector<1x32xf32> to vector<8x32xf32>
    %84 = arith.addf %81, %83 : vector<8x32xf32>
    %c0_62 = arith.constant 0 : index
    %c0_63 = arith.constant 0 : index
    %85 = vector.load %arg5[%c0_62, %c0_63] : memref<32x32xf32, #tpu.memory_space<vmem>>, vector<32x32xf32>
    %cst_64 = arith.constant dense<0.000000e+00> : vector<8x32xf32>
    %86 = tpu.matmul %84, %85, %cst_64 {dimension_numbers = #tpu.dot_dimension_numbers<[1], [0], [0], [1], [0, 0, 1, 1], [], []>} : vector<8x32xf32>, vector<32x32xf32>, vector<8x32xf32> -> vector<8x32xf32>
    %87 = arith.subf %84, %86 : vector<8x32xf32>
    %88 = arith.mulf %87, %87 : vector<8x32xf32>
    %c0_65 = arith.constant 0 : index
    %c0_66 = arith.constant 0 : index
    %89 = vector.load %arg5[%c0_65, %c0_66] : memref<32x32xf32, #tpu.memory_space<vmem>>, vector<32x32xf32>
    %cst_67 = arith.constant dense<0.000000e+00> : vector<8x32xf32>
    %90 = tpu.matmul %88, %89, %cst_67 {dimension_numbers = #tpu.dot_dimension_numbers<[1], [0], [0], [1], [0, 0, 1, 1], [], []>} : vector<8x32xf32>, vector<32x32xf32>, vector<8x32xf32> -> vector<8x32xf32>
    %cst_68 = arith.constant 9.99999974E-6 : f32
    %91 = vector.broadcast %cst_68 : f32 to vector<8x32xf32>
    %92 = arith.addf %90, %91 : vector<8x32xf32>
    %93 = math.rsqrt %92 : vector<8x32xf32>
    %94 = arith.mulf %87, %93 : vector<8x32xf32>
    %c0_69 = arith.constant 0 : index
    %c0_70 = arith.constant 0 : index
    %95 = vector.load %arg6[%c0_69, %c0_70] : memref<1x32xf32, #tpu.memory_space<vmem>>, vector<1x32xf32>
    %96 = vector.broadcast %95 : vector<1x32xf32> to vector<8x32xf32>
    %97 = arith.mulf %94, %96 : vector<8x32xf32>
    %c0_71 = arith.constant 0 : index
    %c0_72 = arith.constant 0 : index
    %98 = vector.load %arg7[%c0_71, %c0_72] : memref<1x32xf32, #tpu.memory_space<vmem>>, vector<1x32xf32>
    %99 = vector.broadcast %98 : vector<1x32xf32> to vector<8x32xf32>
    %100 = arith.addf %97, %99 : vector<8x32xf32>
    %101 = arith.truncf %100 : vector<8x32xf32> to vector<8x32xbf16>
    %c0_73 = arith.constant 0 : index
    %c0_74 = arith.constant 0 : index
    %102 = vector.load %arg8[%c0_73, %c0_74] : memref<32x128xbf16, #tpu.memory_space<vmem>>, vector<32x128xbf16>
    %cst_75 = arith.constant dense<0.000000e+00> : vector<8x128xf32>
    %103 = tpu.matmul %101, %102, %cst_75 {dimension_numbers = #tpu.dot_dimension_numbers<[1], [0], [0], [1], [0, 0, 1, 1], [], []>} : vector<8x32xbf16>, vector<32x128xbf16>, vector<8x128xf32> -> vector<8x128xf32>
    %c0_76 = arith.constant 0 : index
    %c0_77 = arith.constant 0 : index
    %104 = vector.load %arg9[%c0_76, %c0_77] : memref<1x128xf32, #tpu.memory_space<vmem>>, vector<1x128xf32>
    %105 = vector.broadcast %104 : vector<1x128xf32> to vector<8x128xf32>
    %106 = arith.addf %103, %105 : vector<8x128xf32>
    %cst_78 = arith.constant 5.000000e-01 : f32
    %107 = vector.broadcast %cst_78 : f32 to vector<8x128xf32>
    %108 = arith.mulf %107, %106 : vector<8x128xf32>
    %cst_79 = arith.constant 4.471500e-02 : f32
    %109 = vector.broadcast %cst_79 : f32 to vector<8x128xf32>
    %110 = arith.mulf %109, %106 : vector<8x128xf32>
    %111 = arith.mulf %110, %106 : vector<8x128xf32>
    %112 = arith.mulf %111, %106 : vector<8x128xf32>
    %113 = arith.addf %106, %112 : vector<8x128xf32>
    %cst_80 = arith.constant 0.797884583 : f32
    %114 = vector.broadcast %cst_80 : f32 to vector<8x128xf32>
    %115 = arith.mulf %114, %113 : vector<8x128xf32>
    %116 = math.tanh %115 : vector<8x128xf32>
    %cst_81 = arith.constant 1.000000e+00 : f32
    %117 = vector.broadcast %cst_81 : f32 to vector<8x128xf32>
    %118 = arith.addf %117, %116 : vector<8x128xf32>
    %119 = arith.mulf %108, %118 : vector<8x128xf32>
    %120 = arith.truncf %119 : vector<8x128xf32> to vector<8x128xbf16>
    %c0_82 = arith.constant 0 : index
    %c0_83 = arith.constant 0 : index
    %121 = vector.load %arg10[%c0_82, %c0_83] : memref<128x32xbf16, #tpu.memory_space<vmem>>, vector<128x32xbf16>
    %cst_84 = arith.constant dense<0.000000e+00> : vector<8x32xf32>
    %122 = tpu.matmul %120, %121, %cst_84 {dimension_numbers = #tpu.dot_dimension_numbers<[1], [0], [0], [1], [0, 0, 1, 1], [], []>} : vector<8x128xbf16>, vector<128x32xbf16>, vector<8x32xf32> -> vector<8x32xf32>
    %c0_85 = arith.constant 0 : index
    %c0_86 = arith.constant 0 : index
    %123 = vector.load %arg11[%c0_85, %c0_86] : memref<1x32xf32, #tpu.memory_space<vmem>>, vector<1x32xf32>
    %124 = vector.broadcast %123 : vector<1x32xf32> to vector<8x32xf32>
    %125 = arith.addf %122, %124 : vector<8x32xf32>
    %c1_i32_87 = arith.constant 1 : i32
    %126 = arith.addi %arg1, %c1_i32_87 : i32
    %c0_88 = arith.constant 0 : index
    %127 = arith.index_cast %126 : i32 to index
    %c1_89 = arith.constant 1 : index
    %c0_90 = arith.constant 0 : index
    %128 = vector.load %arg2[%c0_88, %127, %c1_89, %c0_90] : memref<1x10x10x32xf32, #tpu.memory_space<vmem>>, vector<1x1x8x32xf32>
    %129 = vector.shape_cast %128 : vector<1x1x8x32xf32> to vector<8x32xf32>
    %130 = arith.addf %125, %129 : vector<8x32xf32>
    %c0_91 = arith.constant 0 : index
    %c0_92 = arith.constant 0 : index
    %c0_93 = arith.constant 0 : index
    %c0_94 = arith.constant 0 : index
    %131 = vector.load %arg12[%c0_91, %c0_92, %c0_93, %c0_94] : memref<1x1x8x32xf32, #tpu.memory_space<vmem>>, vector<1x1x8x32xf32>
    %132 = vector.shape_cast %131 : vector<1x1x8x32xf32> to vector<8x32xf32>
    %133 = vector.shape_cast %130 : vector<8x32xf32> to vector<1x1x8x32xf32>
    tpu.vector_store %arg12[%c0_91, %c0_92, %c0_93, %c0_94], %133 {strides = array<i32>} : memref<1x1x8x32xf32, #tpu.memory_space<vmem>>, vector<1x1x8x32xf32>,
    return
  }
  func.func @transform_0(%arg0: i32, %arg1: i32) -> (i32, i32, i32, i32) {
    %c0_i32 = arith.constant 0 : i32
    %c0_i32_0 = arith.constant 0 : i32
    %c0_i32_1 = arith.constant 0 : i32
    %c0_i32_2 = arith.constant 0 : i32
    return %arg0, %c0_i32, %c0_i32_0, %c0_i32_1 : i32, i32, i32, i32
  }
  func.func @transform_1(%arg0: i32, %arg1: i32) -> (i32, i32, i32) {
    %c0_i32 = arith.constant 0 : i32
    %c0_i32_0 = arith.constant 0 : i32
    %c0_i32_1 = arith.constant 0 : i32
    %c0_i32_2 = arith.constant 0 : i32
    return %c0_i32, %c0_i32_0, %c0_i32_1 : i32, i32, i32
  }
  func.func @transform_2(%arg0: i32, %arg1: i32) -> (i32, i32) {
    %c0_i32 = arith.constant 0 : i32
    %c0_i32_0 = arith.constant 0 : i32
    %c0_i32_1 = arith.constant 0 : i32
    return %c0_i32, %c0_i32_0 : i32, i32
  }
  func.func @transform_3(%arg0: i32, %arg1: i32) -> (i32, i32) {
    %c0_i32 = arith.constant 0 : i32
    %c0_i32_0 = arith.constant 0 : i32
    %c0_i32_1 = arith.constant 0 : i32
    return %c0_i32, %c0_i32_0 : i32, i32
  }
  func.func @transform_4(%arg0: i32, %arg1: i32) -> (i32, i32) {
    %c0_i32 = arith.constant 0 : i32
    %c0_i32_0 = arith.constant 0 : i32
    %c0_i32_1 = arith.constant 0 : i32
    return %c0_i32, %c0_i32_0 : i32, i32
  }
  func.func @transform_5(%arg0: i32, %arg1: i32) -> (i32, i32) {
    %c0_i32 = arith.constant 0 : i32
    %c0_i32_0 = arith.constant 0 : i32
    %c0_i32_1 = arith.constant 0 : i32
    return %c0_i32, %c0_i32_0 : i32, i32
  }
  func.func @transform_6(%arg0: i32, %arg1: i32) -> (i32, i32) {
    %c0_i32 = arith.constant 0 : i32
    %c0_i32_0 = arith.constant 0 : i32
    %c0_i32_1 = arith.constant 0 : i32
    return %c0_i32, %c0_i32_0 : i32, i32
  }
  func.func @transform_7(%arg0: i32, %arg1: i32) -> (i32, i32) {
    %c0_i32 = arith.constant 0 : i32
    %c0_i32_0 = arith.constant 0 : i32
    %c0_i32_1 = arith.constant 0 : i32
    return %c0_i32, %c0_i32_0 : i32, i32
  }
  func.func @transform_8(%arg0: i32, %arg1: i32) -> (i32, i32) {
    %c0_i32 = arith.constant 0 : i32
    %c0_i32_0 = arith.constant 0 : i32
    %c0_i32_1 = arith.constant 0 : i32
    return %c0_i32, %c0_i32_0 : i32, i32
  }
  func.func @transform_9(%arg0: i32, %arg1: i32) -> (i32, i32) {
    %c0_i32 = arith.constant 0 : i32
    %c0_i32_0 = arith.constant 0 : i32
    %c0_i32_1 = arith.constant 0 : i32
    return %c0_i32, %c0_i32_0 : i32, i32
  }
  func.func @transform_10(%arg0: i32, %arg1: i32) -> (i32, i32, i32, i32) {
    %c0_i32 = arith.constant 0 : i32
    %c0_i32_0 = arith.constant 0 : i32
    %c0_i32_1 = arith.constant 0 : i32
    return %arg0, %arg1, %c0_i32, %c0_i32_0 : i32, i32, i32, i32
  }
}

module attributes {stable_mosaic.version = 11 : i64} {
  func.func @_conv_kernel(%arg0: i32, %arg1: i32, %arg2: memref<1x4x4x32xf32, #tpu.memory_space<vmem>>, %arg3: memref<9x32x24xbf16, #tpu.memory_space<vmem>>, %arg4: memref<1x24xf32, #tpu.memory_space<vmem>>, %arg5: memref<1x1x2x24xf32, #tpu.memory_space<vmem>>) attributes {dimension_semantics = [#tpu.dimension_semantics<parallel>, #tpu.dimension_semantics<arbitrary>], iteration_bounds = array<i64: 2, 2>, scalar_prefetch = 0 : i64, scratch_operands = 0 : i64, tpu.core_type = #tpu.core_type<tc>, window_params = [{transform_indices = @transform_0, window_bounds = array<i64: 1, 4, 4, 32>}, {pipeline_mode = #tpu.pipeline_mode<synchronous>, transform_indices = @transform_1, window_bounds = array<i64: 9, 32, 24>}, {pipeline_mode = #tpu.pipeline_mode<synchronous>, transform_indices = @transform_2, window_bounds = array<i64: 1, 24>}, {transform_indices = @transform_3, window_bounds = array<i64: 1, 1, 2, 24>}]} {
    %cst = arith.constant 0.000000e+00 : f32
    %0 = vector.broadcast %cst : f32 to vector<2x24xf32>
    %c0_i32 = arith.constant 0 : i32
    %1 = arith.addi %arg1, %c0_i32 : i32
    %c0 = arith.constant 0 : index
    %2 = arith.index_cast %1 : i32 to index
    %c0_0 = arith.constant 0 : index
    %c0_1 = arith.constant 0 : index
    %3 = vector.load %arg2[%c0, %2, %c0_0, %c0_1] : memref<1x4x4x32xf32, #tpu.memory_space<vmem>>, vector<1x1x2x32xf32>
    %4 = vector.shape_cast %3 : vector<1x1x2x32xf32> to vector<2x32xf32>
    %5 = arith.truncf %4 : vector<2x32xf32> to vector<2x32xbf16>
    %c0_2 = arith.constant 0 : index
    %c0_3 = arith.constant 0 : index
    %c0_4 = arith.constant 0 : index
    %6 = vector.load %arg3[%c0_2, %c0_3, %c0_4] : memref<9x32x24xbf16, #tpu.memory_space<vmem>>, vector<1x32x24xbf16>
    %7 = vector.shape_cast %6 : vector<1x32x24xbf16> to vector<32x24xbf16>
    %cst_5 = arith.constant dense<0.000000e+00> : vector<2x24xf32>
    %8 = tpu.matmul %5, %7, %cst_5 {dimension_numbers = #tpu.dot_dimension_numbers<[1], [0], [0], [1], [0, 0, 1, 1], [], []>} : vector<2x32xbf16>, vector<32x24xbf16>, vector<2x24xf32> -> vector<2x24xf32>
    %9 = arith.addf %0, %8 : vector<2x24xf32>
    %c0_i32_6 = arith.constant 0 : i32
    %10 = arith.addi %arg1, %c0_i32_6 : i32
    %c0_7 = arith.constant 0 : index
    %11 = arith.index_cast %10 : i32 to index
    %c1 = arith.constant 1 : index
    %c0_8 = arith.constant 0 : index
    %12 = vector.load %arg2[%c0_7, %11, %c1, %c0_8] : memref<1x4x4x32xf32, #tpu.memory_space<vmem>>, vector<1x1x2x32xf32>
    %13 = vector.shape_cast %12 : vector<1x1x2x32xf32> to vector<2x32xf32>
    %14 = arith.truncf %13 : vector<2x32xf32> to vector<2x32xbf16>
    %c1_9 = arith.constant 1 : index
    %c0_10 = arith.constant 0 : index
    %c0_11 = arith.constant 0 : index
    %15 = vector.load %arg3[%c1_9, %c0_10, %c0_11] : memref<9x32x24xbf16, #tpu.memory_space<vmem>>, vector<1x32x24xbf16>
    %16 = vector.shape_cast %15 : vector<1x32x24xbf16> to vector<32x24xbf16>
    %cst_12 = arith.constant dense<0.000000e+00> : vector<2x24xf32>
    %17 = tpu.matmul %14, %16, %cst_12 {dimension_numbers = #tpu.dot_dimension_numbers<[1], [0], [0], [1], [0, 0, 1, 1], [], []>} : vector<2x32xbf16>, vector<32x24xbf16>, vector<2x24xf32> -> vector<2x24xf32>
    %18 = arith.addf %9, %17 : vector<2x24xf32>
    %c0_i32_13 = arith.constant 0 : i32
    %19 = arith.addi %arg1, %c0_i32_13 : i32
    %c0_14 = arith.constant 0 : index
    %20 = arith.index_cast %19 : i32 to index
    %c2 = arith.constant 2 : index
    %c0_15 = arith.constant 0 : index
    %21 = vector.load %arg2[%c0_14, %20, %c2, %c0_15] : memref<1x4x4x32xf32, #tpu.memory_space<vmem>>, vector<1x1x2x32xf32>
    %22 = vector.shape_cast %21 : vector<1x1x2x32xf32> to vector<2x32xf32>
    %23 = arith.truncf %22 : vector<2x32xf32> to vector<2x32xbf16>
    %c2_16 = arith.constant 2 : index
    %c0_17 = arith.constant 0 : index
    %c0_18 = arith.constant 0 : index
    %24 = vector.load %arg3[%c2_16, %c0_17, %c0_18] : memref<9x32x24xbf16, #tpu.memory_space<vmem>>, vector<1x32x24xbf16>
    %25 = vector.shape_cast %24 : vector<1x32x24xbf16> to vector<32x24xbf16>
    %cst_19 = arith.constant dense<0.000000e+00> : vector<2x24xf32>
    %26 = tpu.matmul %23, %25, %cst_19 {dimension_numbers = #tpu.dot_dimension_numbers<[1], [0], [0], [1], [0, 0, 1, 1], [], []>} : vector<2x32xbf16>, vector<32x24xbf16>, vector<2x24xf32> -> vector<2x24xf32>
    %27 = arith.addf %18, %26 : vector<2x24xf32>
    %c1_i32 = arith.constant 1 : i32
    %28 = arith.addi %arg1, %c1_i32 : i32
    %c0_20 = arith.constant 0 : index
    %29 = arith.index_cast %28 : i32 to index
    %c0_21 = arith.constant 0 : index
    %c0_22 = arith.constant 0 : index
    %30 = vector.load %arg2[%c0_20, %29, %c0_21, %c0_22] : memref<1x4x4x32xf32, #tpu.memory_space<vmem>>, vector<1x1x2x32xf32>
    %31 = vector.shape_cast %30 : vector<1x1x2x32xf32> to vector<2x32xf32>
    %32 = arith.truncf %31 : vector<2x32xf32> to vector<2x32xbf16>
    %c3 = arith.constant 3 : index
    %c0_23 = arith.constant 0 : index
    %c0_24 = arith.constant 0 : index
    %33 = vector.load %arg3[%c3, %c0_23, %c0_24] : memref<9x32x24xbf16, #tpu.memory_space<vmem>>, vector<1x32x24xbf16>
    %34 = vector.shape_cast %33 : vector<1x32x24xbf16> to vector<32x24xbf16>
    %cst_25 = arith.constant dense<0.000000e+00> : vector<2x24xf32>
    %35 = tpu.matmul %32, %34, %cst_25 {dimension_numbers = #tpu.dot_dimension_numbers<[1], [0], [0], [1], [0, 0, 1, 1], [], []>} : vector<2x32xbf16>, vector<32x24xbf16>, vector<2x24xf32> -> vector<2x24xf32>
    %36 = arith.addf %27, %35 : vector<2x24xf32>
    %c1_i32_26 = arith.constant 1 : i32
    %37 = arith.addi %arg1, %c1_i32_26 : i32
    %c0_27 = arith.constant 0 : index
    %38 = arith.index_cast %37 : i32 to index
    %c1_28 = arith.constant 1 : index
    %c0_29 = arith.constant 0 : index
    %39 = vector.load %arg2[%c0_27, %38, %c1_28, %c0_29] : memref<1x4x4x32xf32, #tpu.memory_space<vmem>>, vector<1x1x2x32xf32>
    %40 = vector.shape_cast %39 : vector<1x1x2x32xf32> to vector<2x32xf32>
    %41 = arith.truncf %40 : vector<2x32xf32> to vector<2x32xbf16>
    %c4 = arith.constant 4 : index
    %c0_30 = arith.constant 0 : index
    %c0_31 = arith.constant 0 : index
    %42 = vector.load %arg3[%c4, %c0_30, %c0_31] : memref<9x32x24xbf16, #tpu.memory_space<vmem>>, vector<1x32x24xbf16>
    %43 = vector.shape_cast %42 : vector<1x32x24xbf16> to vector<32x24xbf16>
    %cst_32 = arith.constant dense<0.000000e+00> : vector<2x24xf32>
    %44 = tpu.matmul %41, %43, %cst_32 {dimension_numbers = #tpu.dot_dimension_numbers<[1], [0], [0], [1], [0, 0, 1, 1], [], []>} : vector<2x32xbf16>, vector<32x24xbf16>, vector<2x24xf32> -> vector<2x24xf32>
    %45 = arith.addf %36, %44 : vector<2x24xf32>
    %c1_i32_33 = arith.constant 1 : i32
    %46 = arith.addi %arg1, %c1_i32_33 : i32
    %c0_34 = arith.constant 0 : index
    %47 = arith.index_cast %46 : i32 to index
    %c2_35 = arith.constant 2 : index
    %c0_36 = arith.constant 0 : index
    %48 = vector.load %arg2[%c0_34, %47, %c2_35, %c0_36] : memref<1x4x4x32xf32, #tpu.memory_space<vmem>>, vector<1x1x2x32xf32>
    %49 = vector.shape_cast %48 : vector<1x1x2x32xf32> to vector<2x32xf32>
    %50 = arith.truncf %49 : vector<2x32xf32> to vector<2x32xbf16>
    %c5 = arith.constant 5 : index
    %c0_37 = arith.constant 0 : index
    %c0_38 = arith.constant 0 : index
    %51 = vector.load %arg3[%c5, %c0_37, %c0_38] : memref<9x32x24xbf16, #tpu.memory_space<vmem>>, vector<1x32x24xbf16>
    %52 = vector.shape_cast %51 : vector<1x32x24xbf16> to vector<32x24xbf16>
    %cst_39 = arith.constant dense<0.000000e+00> : vector<2x24xf32>
    %53 = tpu.matmul %50, %52, %cst_39 {dimension_numbers = #tpu.dot_dimension_numbers<[1], [0], [0], [1], [0, 0, 1, 1], [], []>} : vector<2x32xbf16>, vector<32x24xbf16>, vector<2x24xf32> -> vector<2x24xf32>
    %54 = arith.addf %45, %53 : vector<2x24xf32>
    %c2_i32 = arith.constant 2 : i32
    %55 = arith.addi %arg1, %c2_i32 : i32
    %c0_40 = arith.constant 0 : index
    %56 = arith.index_cast %55 : i32 to index
    %c0_41 = arith.constant 0 : index
    %c0_42 = arith.constant 0 : index
    %57 = vector.load %arg2[%c0_40, %56, %c0_41, %c0_42] : memref<1x4x4x32xf32, #tpu.memory_space<vmem>>, vector<1x1x2x32xf32>
    %58 = vector.shape_cast %57 : vector<1x1x2x32xf32> to vector<2x32xf32>
    %59 = arith.truncf %58 : vector<2x32xf32> to vector<2x32xbf16>
    %c6 = arith.constant 6 : index
    %c0_43 = arith.constant 0 : index
    %c0_44 = arith.constant 0 : index
    %60 = vector.load %arg3[%c6, %c0_43, %c0_44] : memref<9x32x24xbf16, #tpu.memory_space<vmem>>, vector<1x32x24xbf16>
    %61 = vector.shape_cast %60 : vector<1x32x24xbf16> to vector<32x24xbf16>
    %cst_45 = arith.constant dense<0.000000e+00> : vector<2x24xf32>
    %62 = tpu.matmul %59, %61, %cst_45 {dimension_numbers = #tpu.dot_dimension_numbers<[1], [0], [0], [1], [0, 0, 1, 1], [], []>} : vector<2x32xbf16>, vector<32x24xbf16>, vector<2x24xf32> -> vector<2x24xf32>
    %63 = arith.addf %54, %62 : vector<2x24xf32>
    %c2_i32_46 = arith.constant 2 : i32
    %64 = arith.addi %arg1, %c2_i32_46 : i32
    %c0_47 = arith.constant 0 : index
    %65 = arith.index_cast %64 : i32 to index
    %c1_48 = arith.constant 1 : index
    %c0_49 = arith.constant 0 : index
    %66 = vector.load %arg2[%c0_47, %65, %c1_48, %c0_49] : memref<1x4x4x32xf32, #tpu.memory_space<vmem>>, vector<1x1x2x32xf32>
    %67 = vector.shape_cast %66 : vector<1x1x2x32xf32> to vector<2x32xf32>
    %68 = arith.truncf %67 : vector<2x32xf32> to vector<2x32xbf16>
    %c7 = arith.constant 7 : index
    %c0_50 = arith.constant 0 : index
    %c0_51 = arith.constant 0 : index
    %69 = vector.load %arg3[%c7, %c0_50, %c0_51] : memref<9x32x24xbf16, #tpu.memory_space<vmem>>, vector<1x32x24xbf16>
    %70 = vector.shape_cast %69 : vector<1x32x24xbf16> to vector<32x24xbf16>
    %cst_52 = arith.constant dense<0.000000e+00> : vector<2x24xf32>
    %71 = tpu.matmul %68, %70, %cst_52 {dimension_numbers = #tpu.dot_dimension_numbers<[1], [0], [0], [1], [0, 0, 1, 1], [], []>} : vector<2x32xbf16>, vector<32x24xbf16>, vector<2x24xf32> -> vector<2x24xf32>
    %72 = arith.addf %63, %71 : vector<2x24xf32>
    %c2_i32_53 = arith.constant 2 : i32
    %73 = arith.addi %arg1, %c2_i32_53 : i32
    %c0_54 = arith.constant 0 : index
    %74 = arith.index_cast %73 : i32 to index
    %c2_55 = arith.constant 2 : index
    %c0_56 = arith.constant 0 : index
    %75 = vector.load %arg2[%c0_54, %74, %c2_55, %c0_56] : memref<1x4x4x32xf32, #tpu.memory_space<vmem>>, vector<1x1x2x32xf32>
    %76 = vector.shape_cast %75 : vector<1x1x2x32xf32> to vector<2x32xf32>
    %77 = arith.truncf %76 : vector<2x32xf32> to vector<2x32xbf16>
    %c8 = arith.constant 8 : index
    %c0_57 = arith.constant 0 : index
    %c0_58 = arith.constant 0 : index
    %78 = vector.load %arg3[%c8, %c0_57, %c0_58] : memref<9x32x24xbf16, #tpu.memory_space<vmem>>, vector<1x32x24xbf16>
    %79 = vector.shape_cast %78 : vector<1x32x24xbf16> to vector<32x24xbf16>
    %cst_59 = arith.constant dense<0.000000e+00> : vector<2x24xf32>
    %80 = tpu.matmul %77, %79, %cst_59 {dimension_numbers = #tpu.dot_dimension_numbers<[1], [0], [0], [1], [0, 0, 1, 1], [], []>} : vector<2x32xbf16>, vector<32x24xbf16>, vector<2x24xf32> -> vector<2x24xf32>
    %81 = arith.addf %72, %80 : vector<2x24xf32>
    %c0_60 = arith.constant 0 : index
    %c0_61 = arith.constant 0 : index
    %82 = vector.load %arg4[%c0_60, %c0_61] : memref<1x24xf32, #tpu.memory_space<vmem>>, vector<1x24xf32>
    %83 = vector.broadcast %82 : vector<1x24xf32> to vector<2x24xf32>
    %84 = arith.addf %81, %83 : vector<2x24xf32>
    %c0_62 = arith.constant 0 : index
    %c0_63 = arith.constant 0 : index
    %c0_64 = arith.constant 0 : index
    %c0_65 = arith.constant 0 : index
    %85 = vector.load %arg5[%c0_62, %c0_63, %c0_64, %c0_65] : memref<1x1x2x24xf32, #tpu.memory_space<vmem>>, vector<1x1x2x24xf32>
    %86 = vector.shape_cast %85 : vector<1x1x2x24xf32> to vector<2x24xf32>
    %87 = vector.shape_cast %84 : vector<2x24xf32> to vector<1x1x2x24xf32>
    tpu.vector_store %arg5[%c0_62, %c0_63, %c0_64, %c0_65], %87 {strides = array<i32>} : memref<1x1x2x24xf32, #tpu.memory_space<vmem>>, vector<1x1x2x24xf32>,
    return
  }
  func.func @transform_0(%arg0: i32, %arg1: i32) -> (i32, i32, i32, i32) {
    %c0_i32 = arith.constant 0 : i32
    %c0_i32_0 = arith.constant 0 : i32
    %c0_i32_1 = arith.constant 0 : i32
    %c0_i32_2 = arith.constant 0 : i32
    return %arg0, %c0_i32, %c0_i32_0, %c0_i32_1 : i32, i32, i32, i32
  }
  func.func @transform_1(%arg0: i32, %arg1: i32) -> (i32, i32, i32) {
    %c0_i32 = arith.constant 0 : i32
    %c0_i32_0 = arith.constant 0 : i32
    %c0_i32_1 = arith.constant 0 : i32
    %c0_i32_2 = arith.constant 0 : i32
    return %c0_i32, %c0_i32_0, %c0_i32_1 : i32, i32, i32
  }
  func.func @transform_2(%arg0: i32, %arg1: i32) -> (i32, i32) {
    %c0_i32 = arith.constant 0 : i32
    %c0_i32_0 = arith.constant 0 : i32
    %c0_i32_1 = arith.constant 0 : i32
    return %c0_i32, %c0_i32_0 : i32, i32
  }
  func.func @transform_3(%arg0: i32, %arg1: i32) -> (i32, i32, i32, i32) {
    %c0_i32 = arith.constant 0 : i32
    %c0_i32_0 = arith.constant 0 : i32
    %c0_i32_1 = arith.constant 0 : i32
    return %arg0, %arg1, %c0_i32, %c0_i32_0 : i32, i32, i32, i32
  }
}

</mosaic_0001>

<bundles_post_ra>
// kernel: encoder_forward.6
= control target key start
LH: loop header
LB: loop body
LE: loop exit
PB: predicated region body
PF: predicated region fallthrough
CT: control target
= control target key end

     0   :  { %s393_s6 = smov 0   ;;  %s582_s0 = inlined_call_operand.vmem [shape: f32[2,10,2,10,64], index: 0, kind: input, shape index: {}]   ;;  %s583_s1 = inlined_call_operand.vmem [shape: f32[2,10,10,32], index: 1, kind: output, shape index: {}]  }
   0x1 LB: > { %s354_s7 = sadd.s32 4294967295, %s380_s6   ;;  %p358_p0 = scmp.ge.s32.totalorder %s380_s6, 1  ;;  %s380_s6 = sphi %s393_s6, %s11_s6  }
   0x2   : > { %p87_p1 = scmp.lt.s32.totalorder %s380_s6, 3 }
   0x4   : > { %p88_p2 = pnand %p358_p0, %p87_p1 }
   0x5   : > { %p107_p3 = scmp.lt.s32.totalorder (!%p88_p2), %s354_s7, 1  ;;  %s382_s12 = smov (!%p88_p2), 96  }
   0x6   : > { %91 = sbr.rel (%p88_p2) target bundleno = 185 (0xb9), region = 24 }
   0xb   : > { %s585_s7 = smov (!%p107_p3, %s354_s7), 1  ;;  %vm277_vm0 = vcmask 261120   ;;  %vm279_vm1 = vcmask 254976  }
   0xc   : > { %s363_s8 = smul.u32 320, %s585_s7 }
   0xd   : > { %s364_s13 = smul.u32 160, %s585_s7 }
   0xe   : > { %s407_s11 = scalar_lea.vmem %s582_s0, %s363_s8 }
   0xf   : > { %v121_v0 = vld [vmem:[%s407_s11 + $0x20] sm:$0xff]  ;;  %v123_v1 = vld [vmem:[%s407_s11 + $0x30] sm:$0xff]  ;;  %v122_v6 = vld [vmem:[%s407_s11 + $0x28] sm:$0x3]  ;;  %s522_s16 = scalar_lea.vmem %s583_s1, %s364_s13 }
  0x10   : > { %v117_v2 = vld [vmem:[%s407_s11] sm:$0xff]  ;;  %v412_v3 = vmax.f32 %v121_v0, %v123_v1  ;;  %v119_v4 = vld [vmem:[%s407_s11 + $0x10] sm:$0xff]  ;;  %v124_v7 = vld [vmem:[%s407_s11 + $0x38] sm:$0x3] }
  0x11   : > { %v415_v5 = vmax.f32 %v117_v2, %v119_v4  ;;  %v118_v8 = vld [vmem:[%s407_s11 + $0x8] sm:$0x3]  ;;  %v120_v9 = vld [vmem:[%s407_s11 + $0x18] sm:$0x3]  ;;  %v125_v10 = vld [vmem:[%s407_s11 + $0x40] sm:$0xff]  ;;  %v429_v13 = vmax.f32 %v122_v6, %v124_v7 }
  0x12   : > { %201 = vrot.lane.b32.xlu1 %v412_v3, %s382_s12  ;;  %v127_v11 = vld [vmem:[%s407_s11 + $0x50] sm:$0xff]  ;;  %v431_v14 = vmax.f32 %v118_v8, %v120_v9  ;;  %v126_v15 = vld [vmem:[%s407_s11 + $0x48] sm:$0x3]  ;;  %v128_v16 = vld [vmem:[%s407_s11 + $0x58] sm:$0x3] }
  0x13   : > { %197 = vrot.lane.b32.xlu0 %v415_v5, %s382_s12  ;;  %v427_v12 = vmax.f32 %v125_v10, %v127_v11  ;;  %v130_v17 = vld [vmem:[%s407_s11 + $0x68] sm:$0x3]  ;;  %v132_v18 = vld [vmem:[%s407_s11 + $0x78] sm:$0x3]  ;;  %v443_v19 = vmax.f32 %v126_v15, %v128_v16  ;;  %v129_v20 = vld [vmem:[%s407_s11 + $0x60] sm:$0xff] }
  0x14   : > { %v131_v21 = vld [vmem:[%s407_s11 + $0x70] sm:$0xff]  ;;  %v447_v22 = vmax.f32 %v130_v17, %v132_v18  ;;  %v133_v24 = vld [vmem:[%s407_s11 + $0x80] sm:$0xff]  ;;  %v134_v29 = vld [vmem:[%s407_s11 + $0x88] sm:$0x3] }
  0x15   : > { %205 = vrot.lane.b32.xlu2 %v427_v12, %s382_s12  ;;  %v449_v23 = vmax.f32 %v129_v20, %v131_v21  ;;  %v135_v25 = vld [vmem:[%s407_s11 + $0x90] sm:$0xff]  ;;  %v137_v26 = vld [vmem:[%s407_s11 + $0xa0] sm:$0xff]  ;;  %v136_v30 = vld [vmem:[%s407_s11 + $0x98] sm:$0x3] }
  0x16   : > { %v139_v27 = vld [vmem:[%s407_s11 + $0xb0] sm:$0xff]  ;;  %v165_v28 = vmax.f32 %v133_v24, %v135_v25  ;;  %v465_v32 = vmax.f32 %v134_v29, %v136_v30  ;;  %v138_v33 = vld [vmem:[%s407_s11 + $0xa8] sm:$0x3]  ;;  %v140_v34 = vld [vmem:[%s407_s11 + $0xb8] sm:$0x3] }
  0x17   : > { %v463_v31 = vmax.f32 %v137_v26, %v139_v27  ;;  %v142_v35 = vld [vmem:[%s407_s11 + $0xc8] sm:$0x3]  ;;  %v144_v36 = vld [vmem:[%s407_s11 + $0xd8] sm:$0x3]  ;;  %v168_v37 = vmax.f32 %v138_v33, %v140_v34  ;;  %v141_v38 = vld [vmem:[%s407_s11 + $0xc0] sm:$0xff] }
  0x18   : > { %v143_v39 = vld [vmem:[%s407_s11 + $0xd0] sm:$0xff]  ;;  %v478_v40 = vmax.f32 %v142_v35, %v144_v36  ;;  %v145_v42 = vld [vmem:[%s407_s11 + $0xe0] sm:$0xff]  ;;  %v146_v47 = vld [vmem:[%s407_s11 + $0xe8] sm:$0x3] }
  0x19   : > { %v480_v41 = vmax.f32 %v141_v38, %v143_v39  ;;  %v147_v43 = vld [vmem:[%s407_s11 + $0xf0] sm:$0xff]  ;;  %v149_v44 = vld [vmem:[%s407_s11 + $0x100] sm:$0xff]  ;;  %v148_v48 = vld [vmem:[%s407_s11 + $0xf8] sm:$0x3] }
  0x1a   : > { %203 = vrot.lane.b32.xlu1 %v429_v13, %s382_s12  ;;  %v151_v45 = vld [vmem:[%s407_s11 + $0x110] sm:$0xff]  ;;  %v171_v46 = vmax.f32 %v145_v42, %v147_v43  ;;  %v495_v50 = vmax.f32 %v146_v47, %v148_v48  ;;  %v150_v51 = vld [vmem:[%s407_s11 + $0x108] sm:$0x3]  ;;  %v152_v52 = vld [vmem:[%s407_s11 + $0x118] sm:$0x3] }
  0x1b   : > { %199 = vrot.lane.b32.xlu0 %v431_v14, %s382_s12  ;;  %v493_v49 = vmax.f32 %v149_v44, %v151_v45  ;;  %v154_v53 = vld [vmem:[%s407_s11 + $0x128] sm:$0x3]  ;;  %v156_v54 = vld [vmem:[%s407_s11 + $0x138] sm:$0x3]  ;;  %v174_v55 = vmax.f32 %v150_v51, %v152_v52  ;;  %v153_v56 = vld [vmem:[%s407_s11 + $0x120] sm:$0xff] }
  0x1c   : > { %v155_v57 = vld [vmem:[%s407_s11 + $0x130] sm:$0xff]  ;;  %v508_v58 = vmax.f32 %v154_v53, %v156_v54 }
  0x1d   : > { %207 = vrot.lane.b32.xlu2 %v443_v19, %s382_s12  ;;  %v510_v59 = vmax.f32 %v153_v56, %v155_v57 }
  0x22   : > { %211 = vrot.lane.b32.xlu1 %v447_v22, %s382_s12 }
  0x23   : > { %209 = vrot.lane.b32.xlu0 %v449_v23, %s382_s12 }
  0x25   : > { %213 = vrot.lane.b32.xlu2 %v165_v28, %s382_s12 }
  0x2a   : > { %217 = vrot.lane.b32.xlu1 %v463_v31, %s382_s12 }
  0x2b   : > { %215 = vrot.lane.b32.xlu0 %v465_v32, %s382_s12 }
  0x2d   : > { %219 = vrot.lane.b32.xlu2 %v168_v37, %s382_s12 }
  0x32   : > { %223 = vrot.lane.b32.xlu1 %v478_v40, %s382_s12 }
  0x33   : > { %221 = vrot.lane.b32.xlu0 %v480_v41, %s382_s12 }
  0x35   : > { %225 = vrot.lane.b32.xlu2 %v171_v46, %s382_s12 }
  0x3a   : > { %229 = vrot.lane.b32.xlu1 %v493_v49, %s382_s12 }
  0x3b   : > { %227 = vrot.lane.b32.xlu0 %v495_v50, %s382_s12 }
  0x3d   : > { %231 = vrot.lane.b32.xlu2 %v174_v55, %s382_s12 }
  0x42   : > { %235 = vrot.lane.b32.xlu1 %v508_v58, %s382_s12 }
  0x43   : > { %233 = vrot.lane.b32.xlu0 %v510_v59, %s382_s12 }
  0x6f   : > { %v206_v60 = vpop.permute.xlu2 %205 }
  0x70   : > { %v261_v61 = vmax.f32 %v427_v12, %v206_v60 }
  0x72   : > { %283 = vst.msk [vmem:[%s522_s16 + $0x20] sm:$0xff] %vm277_vm0, %v261_v61 }
  0x77   : > { %v208_v62 = vpop.permute.xlu2 %207 }
  0x78   : > { %v262_v63 = vmax.f32 %v443_v19, %v208_v62 }
  0x7a   : > { %284 = vst.msk [vmem:[%s522_s16 + $0x28] sm:$0x3] %vm279_vm1, %v262_v63 }
  0x7f   : > { %v214_v0 = vpop.permute.xlu2 %213 }
  0x80   : > { %v265_v1 = vmax.f32 %v165_v28, %v214_v0 }
  0x82   : > { %287 = vst.msk [vmem:[%s522_s16 + $0x40] sm:$0xff] %vm277_vm0, %v265_v1 }
  0x84   : > { %v202_v2 = vpop.permute.xlu1 %201 }
  0x85   : > { %v259_v4 = vmax.f32 %v412_v3, %v202_v2  ;;  %v198_v6 = vpop.permute.xlu0 %197 }
  0x86   : > { %v257_v7 = vmax.f32 %v415_v5, %v198_v6 }
  0x87   : > { %281 = vst.msk [vmem:[%s522_s16 + $0x10] sm:$0xff] %vm277_vm0, %v259_v4  ;;  %v220_v8 = vpop.permute.xlu2 %219 }
  0x88   : > { %278 = vst.msk [vmem:[%s522_s16] sm:$0xff] %vm277_vm0, %v257_v7  ;;  %v268_v9 = vmax.f32 %v168_v37, %v220_v8 }
  0x8a   : > { %290 = vst.msk [vmem:[%s522_s16 + $0x58] sm:$0x3] %vm279_vm1, %v268_v9 }
  0x8c   : > { %v204_v10 = vpop.permute.xlu1 %203 }
  0x8d   : > { %v260_v11 = vmax.f32 %v429_v13, %v204_v10  ;;  %v200_v12 = vpop.permute.xlu0 %199 }
  0x8e   : > { %v258_v3 = vmax.f32 %v431_v14, %v200_v12 }
  0x8f   : > { %282 = vst.msk [vmem:[%s522_s16 + $0x18] sm:$0x3] %vm279_vm1, %v260_v11  ;;  %v226_v5 = vpop.permute.xlu2 %225 }
  0x90   : > { %280 = vst.msk [vmem:[%s522_s16 + $0x8] sm:$0x3] %vm279_vm1, %v258_v3  ;;  %v271_v15 = vmax.f32 %v171_v46, %v226_v5 }
  0x92   : > { %293 = vst.msk [vmem:[%s522_s16 + $0x70] sm:$0xff] %vm277_vm0, %v271_v15 }
  0x94   : > { %v212_v16 = vpop.permute.xlu1 %211 }
  0x95   : > { %v264_v17 = vmax.f32 %v447_v22, %v212_v16  ;;  %v210_v18 = vpop.permute.xlu0 %209 }
  0x96   : > { %v263_v13 = vmax.f32 %v449_v23, %v210_v18 }
  0x97   : > { %286 = vst.msk [vmem:[%s522_s16 + $0x38] sm:$0x3] %vm279_vm1, %v264_v17  ;;  %v232_v14 = vpop.permute.xlu2 %231 }
  0x98   : > { %285 = vst.msk [vmem:[%s522_s16 + $0x30] sm:$0xff] %vm277_vm0, %v263_v13  ;;  %v274_v19 = vmax.f32 %v174_v55, %v232_v14 }
  0x9a   : > { %296 = vst.msk [vmem:[%s522_s16 + $0x88] sm:$0x3] %vm279_vm1, %v274_v19 }
  0x9c   : > { %v218_v20 = vpop.permute.xlu1 %217 }
  0x9d   : > { %v267_v21 = vmax.f32 %v463_v31, %v218_v20  ;;  %v216_v24 = vpop.permute.xlu0 %215 }
  0x9e   : > { %v266_v22 = vmax.f32 %v465_v32, %v216_v24 }
  0x9f   : > { %289 = vst.msk [vmem:[%s522_s16 + $0x50] sm:$0xff] %vm277_vm0, %v267_v21 }
  0xa0   : > { %288 = vst.msk [vmem:[%s522_s16 + $0x48] sm:$0x3] %vm279_vm1, %v266_v22 }
  0xa4   : > { %v224_v23 = vpop.permute.xlu1 %223 }
  0xa5   : > { %v270_v25 = vmax.f32 %v478_v40, %v224_v23  ;;  %v222_v26 = vpop.permute.xlu0 %221 }
  0xa6   : > { %v269_v27 = vmax.f32 %v480_v41, %v222_v26 }
  0xa7   : > { %292 = vst.msk [vmem:[%s522_s16 + $0x68] sm:$0x3] %vm279_vm1, %v270_v25 }
  0xa8   : > { %291 = vst.msk [vmem:[%s522_s16 + $0x60] sm:$0xff] %vm277_vm0, %v269_v27 }
  0xac   : > { %v230_v28 = vpop.permute.xlu1 %229 }
  0xad   : > { %v273_v29 = vmax.f32 %v493_v49, %v230_v28  ;;  %v228_v30 = vpop.permute.xlu0 %227 }
  0xae   : > { %v272_v31 = vmax.f32 %v495_v50, %v228_v30 }
  0xaf   : > { %295 = vst.msk [vmem:[%s522_s16 + $0x80] sm:$0xff] %vm277_vm0, %v273_v29 }
  0xb0   : > { %294 = vst.msk [vmem:[%s522_s16 + $0x78] sm:$0x3] %vm279_vm1, %v272_v31 }
  0xb4   : > { %v236_v32 = vpop.permute.xlu1 %235 }
  0xb5   : > { %v276_v33 = vmax.f32 %v508_v58, %v236_v32  ;;  %v234_v34 = vpop.permute.xlu0 %233 }
  0xb6   : > { %v275_v35 = vmax.f32 %v510_v59, %v234_v34 }
  0xb7   : > { %298 = vst.msk [vmem:[%s522_s16 + $0x98] sm:$0x3] %vm279_vm1, %v276_v33 }
  0xb8   : > { %297 = vst.msk [vmem:[%s522_s16 + $0x90] sm:$0xff] %vm277_vm0, %v275_v35 }
  0xb9 PF: > { %s11_s6 = sadd.s32 1, %s380_s6  }
  0xba   : > { %p8_p4 = scmp.ge.s32.totalorder %s11_s6, 4  }
  0xbc   :  { %10 = sbr.rel (!%p8_p4) target bundleno = 1 (0x1), region = 54 }

// kernel: encoder_forward.5
= control target key start
LH: loop header
LB: loop body
LE: loop exit
PB: predicated region body
PF: predicated region fallthrough
CT: control target
= control target key end

     0   :  { %s1045_s21 = smov 0   ;;  %s1047_s22 = smov 0   ;;  %s1213_s0 = inlined_call_operand.vmem [shape: f32[2,22,22,3], index: 0, kind: input, shape index: {}]   ;;  %s1214_s1 = inlined_call_operand.vmem [shape: bf16[9,3,32], index: 1, kind: input, shape index: {}]   ;;  %s1215_s2 = inlined_call_operand.vmem [shape: f32[1,32], index: 2, kind: input, shape index: {}]   ;;  %s1216_s3 = inlined_call_operand.vmem [shape: f32[32,32], index: 3, kind: input, shape index: {}]   ;;  %s1217_s4 = inlined_call_operand.vmem [shape: f32[1,32], index: 4, kind: input, shape index: {}]   ;;  %s1218_s5 = inlined_call_operand.vmem [shape: f32[1,32], index: 5, kind: input, shape index: {}]   ;;  %s1219_s6 = inlined_call_operand.vmem [shape: f32[2,20,20,32], index: 6, kind: output, shape index: {}]  }
   0x1   :  { %s1049_s23 = smov 0   ;;  %s1051_s24 = smov 0  }
   0x2   :  { %s1053_s25 = smov 0  }
   0x3 LB: > { %s25_s26 = sadd.s32 1, %s999_s23  ;;  %s28_s27 = sadd.s32 1, %s1003_s24  ;;  %s1007_s25 = sphi %s1053_s25, %s16_s25   ;;  %s1003_s24 = sphi %s1051_s24, %s1223_s24   ;;  %s999_s23 = sphi %s1049_s23, %s1222_s23   ;;  %s995_s22 = sphi %s1047_s22, %s1221_s22   ;;  %s991_s21 = sphi %s1045_s21, %s1220_s21  }
   0x4   : > { %p26_p0 = scmp.ge.s32.totalorder %s25_s26, 20  ;;  %p860_p1 = scmp.ge.s32.totalorder %s1007_s25, 1 }
   0x5   : > { %p226_p2 = scmp.lt.s32.totalorder %s1007_s25, 41 }
   0x6   : > { %s1225_s26 = smov (%p26_p0, %s25_s26), 0  ;;  %s1227_s27 = smov (!%p26_p0, %s28_s27), %s1003_s24 }
   0x7   : > { %p227_p3 = pnand %p860_p1, %p226_p2  ;;  %p30_p4 = scmp.ge.s32.totalorder %s1227_s27, 2 }
   0x8   : > { %p260_p5 = scmp.lt.s32.totalorder (!%p227_p3), %s995_s22, 1  ;;  %s275_s12 = smul.u32 (!%p227_p3), 24, %s991_s21 }
   0x9   : > { %s1229_s27 = smov (%p30_p4, %s1227_s27), 0  ;;  %230 = sbr.rel (%p227_p3) target bundleno = 516 (0x204), region = 44 }
   0xa   : > { %p267_p6 = scmp.lt.s32.totalorder (!%p227_p3), %s991_s21, 19 }
   0xe   : > { %v863_v0 = vld [vmem:[%s1214_s1 + $0x2] sm:$0x3]  ;;  %vm297_vm0 = vcmask 1040384   ;;  %vm298_vm1 = vcmask 1041408   ;;  %v1009_v1 = vmov 65535   ;;  %s1231_s22 = smov (!%p260_p5, %s995_s22), 1 }
   0xf   : > { %v299_v2 = vsel %vm297_vm0, 4294967295, %v1009_v1  ;;  %v282_v3 = vld [vmem:[%s1214_s1] sm:$0x3]  ;;  %v868_v4 = vld [vmem:[%s1214_s1 + $0x4] sm:$0x3]  ;;  %s916_s17 = smul.u32 528, %s1231_s22 }
  0x10   : > { %v300_v5 = vsel %vm298_vm1, %v299_v2, 0  ;;  %v874_v6 = vld [vmem:[%s1214_s1 + $0x6] sm:$0x3]  ;;  %v880_v11 = vld [vmem:[%s1214_s1 + $0x8] sm:$0x3]  ;;  %vm290_vm2 = vcmask 23552  }
  0x11   : > { %v302_v7 = vand.u32 %v863_v0, %v300_v5  ;;  %v329_v8 = vand.u32 %v300_v5, %v282_v3  ;;  %v363_v9 = vand.u32 %v868_v4, %v300_v5  ;;  %v403_v10 = vand.u32 %v874_v6, %v300_v5  ;;  %v892_v12 = vld [vmem:[%s1214_s1 + $0xc] sm:$0x3]  ;;  %v898_v15 = vld [vmem:[%s1214_s1 + $0xe] sm:$0x3]  ;;  %v886_v16 = vld [vmem:[%s1214_s1 + $0xa] sm:$0x3]  ;;  %s264_s7 = scalar_lea.vmem %s1213_s0, %s916_s17 }
  0x12   : > { %v440_v13 = vand.u32 %v880_v11, %v300_v5  ;;  %v517_v14 = vand.u32 %v892_v12, %v300_v5  ;;  %v477_v17 = vand.u32 %v886_v16, %v300_v5  ;;  %v904_v18 = vld [vmem:[%s1214_s1 + $0x10] sm:$0x3]  ;;  %s1111_s10 = scalar_lea.vmem %s264_s7, %s275_s12  ;;  %v554_v22 = vand.u32 %v898_v15, %v300_v5  ;;  %v624_v2 = vld [vmem:[%s1216_s3 + $0x18] sm:$0xff]  ;;  %v621_v15 = vld [vmem:[%s1216_s3] sm:$0xff]  ;;  %s1233_s21 = smov (!%p267_p6, %s991_s21), 19 }
  0x13   : > { %311 = vmatpush.bf16.msra.mxu0 %v302_v7  ;;  %915 = vmatpush.bf16.msra.mxu3 %v302_v7  ;;  %v283_v19 = vld [vmem:[%s1111_s10 + $0x1] sm:$0xff]  ;;  %v284_v20 = vld [vmem:[%s1111_s10 + $0x9] sm:$0xff]  ;;  %v285_v21 = vld [vmem:[%s1111_s10 + $0x11] sm:$0xf]  ;;  %v591_v28 = vand.u32 %v904_v18, %v300_v5  ;;  %vm625_vm3 = vcmask 261120   ;;  %s918_s28 = smul.u32 60, %s1231_s22 }
  0x14   : > { %338 = vmatpush.bf16.msra.mxu1 %v329_v8  ;;  %372 = vmatpush.bf16.msra.mxu2 %v363_v9  ;;  %v286_v23 = vpack.c.bf16 %v284_v20, %v283_v19  ;;  %v287_v24 = vpack.c.bf16 %v285_v21, %v285_v21  ;;  %v277_v25 = vld [vmem:[%s1111_s10] sm:$0xff]  ;;  %v278_v26 = vld [vmem:[%s1111_s10 + $0x8] sm:$0xff]  ;;  %v871_v32 = vld [vmem:[%s1111_s10 + $0x18] sm:$0xff]  ;;  %s917_s29 = smul.u32 3, %s1233_s21  ;;  %vm760_vm0 = vcmask 257024  }
  0x15   : > { %v349_v27 = vld [vmem:[%s1111_s10 + $0x2] sm:$0xff]  ;;  %v280_v29 = vpack.c.bf16 %v278_v26, %v277_v25  ;;  %v350_v30 = vld [vmem:[%s1111_s10 + $0xa] sm:$0xff]  ;;  %v877_v34 = vld [vmem:[%s1111_s10 + $0x19] sm:$0xff] }
  0x16   : > { %864 = vmatmul.msk.bf16.vlgmr.msra.gmra.mxu0 %vm290_vm2, %v286_v23  ;;  %865 = vmatmul.msk.bf16.vlgmr.msra.gmra.mxu3 %vm290_vm2, %v287_v24  ;;  %v352_v31 = vpack.c.bf16 %v350_v30, %v349_v27  ;;  %v872_v33 = vld [vmem:[%s1111_s10 + $0x20] sm:$0xff]  ;;  %v279_v36 = vld [vmem:[%s1111_s10 + $0x10] sm:$0xf]  ;;  %v873_v42 = vld [vmem:[%s1111_s10 + $0x28] sm:$0xf]  ;;  %s271_s8 = sadd.s32 %s918_s28, %s917_s29 }
  0x17   : > { %412 = vmatpush.bf16.msrb.mxu3 %v403_v10  ;;  %449 = vmatpush.bf16.msrb.mxu0 %v440_v13  ;;  %v878_v35 = vld [vmem:[%s1111_s10 + $0x21] sm:$0xff]  ;;  %v351_v37 = vld [vmem:[%s1111_s10 + $0x12] sm:$0xf]  ;;  %v392_v38 = vpack.c.bf16 %v872_v33, %v871_v32  ;;  %v281_v40 = vpack.c.bf16 %v279_v36, %v279_v36  ;;  %v879_v43 = vld [vmem:[%s1111_s10 + $0x29] sm:$0xf]  ;;  %v393_v48 = vpack.c.bf16 %v873_v42, %v873_v42  ;;  %s862_s21 = sshll.u32 %s271_s8, 3 }
  0x18   : > { %526 = vmatpush.bf16.msrb.mxu2 %v517_v14  ;;  %486 = vmatpush.bf16.msrb.mxu1 %v477_v17  ;;  %v429_v39 = vpack.c.bf16 %v878_v35, %v877_v34  ;;  %v353_v41 = vpack.c.bf16 %v351_v37, %v351_v37  ;;  %v883_v44 = vld [vmem:[%s1111_s10 + $0x1a] sm:$0xff]  ;;  %v884_v45 = vld [vmem:[%s1111_s10 + $0x22] sm:$0xff]  ;;  %v889_v46 = vld [vmem:[%s1111_s10 + $0x30] sm:$0xff]  ;;  %v430_v49 = vpack.c.bf16 %v879_v43, %v879_v43  ;;  %s273_s12 = scalar_lea.vmem %s1219_s6, %s862_s21 }
  0x19   : > { %866 = vmatmul.msk.bf16.vlgmr.msra.gmra.mxu1 %vm290_vm2, %v280_v29  ;;  %869 = vmatmul.msk.bf16.vlgmr.msra.gmra.mxu2 %vm290_vm2, %v352_v31  ;;  %v890_v47 = vld [vmem:[%s1111_s10 + $0x38] sm:$0xff]  ;;  %v466_v50 = vpack.c.bf16 %v884_v45, %v883_v44  ;;  %v885_v56 = vld [vmem:[%s1111_s10 + $0x2a] sm:$0xf]  ;;  %v891_v57 = vld [vmem:[%s1111_s10 + $0x40] sm:$0xf] }
  0x1a   : > { %v506_v51 = vpack.c.bf16 %v890_v47, %v889_v46  ;;  %v895_v52 = vld [vmem:[%s1111_s10 + $0x31] sm:$0xff]  ;;  %v896_v53 = vld [vmem:[%s1111_s10 + $0x39] sm:$0xff]  ;;  %v467_v60 = vpack.c.bf16 %v885_v56, %v885_v56  ;;  %v507_v61 = vpack.c.bf16 %v891_v57, %v891_v57  ;;  %v897_v62 = vld [vmem:[%s1111_s10 + $0x41] sm:$0xf] }
  0x1b   : > { %563 = vmatpush.bf16.msra.mxu3 %v554_v22  ;;  %600 = vmatpush.bf16.msra.mxu0 %v591_v28  ;;  %v901_v54 = vld [vmem:[%s1111_s10 + $0x32] sm:$0xff]  ;;  %v902_v55 = vld [vmem:[%s1111_s10 + $0x3a] sm:$0xff]  ;;  %v543_v58 = vpack.c.bf16 %v896_v53, %v895_v52  ;;  %v903_v63 = vld [vmem:[%s1111_s10 + $0x42] sm:$0xf]  ;;  %v544_v0 = vpack.c.bf16 %v897_v62, %v897_v62 }
  0x1c   : > { %v580_v59 = vpack.c.bf16 %v902_v55, %v901_v54  ;;  %v581_v1 = vpack.c.bf16 %v903_v63, %v903_v63  ;;  %647 = vmatpush.msra.mxu1 %v624_v2  ;;  %688 = vmatpush.msra.mxu2 %v624_v2  ;;  %v623_v5 = vld [vmem:[%s1216_s3 + $0x10] sm:$0xff]  ;;  %v622_v10 = vld [vmem:[%s1216_s3 + $0x8] sm:$0xff]  ;;  %v960_v43 = vld [vmem:[%s1215_s2] ss:$0 sm:$0xff] }
  0x1e   : > { %648 = vmatpush.msra.mxu1 %v623_v5  ;;  %689 = vmatpush.msra.mxu2 %v623_v5 }
  0x20   : > { %649 = vmatpush.msra.mxu1 %v622_v10  ;;  %690 = vmatpush.msra.mxu2 %v622_v10 }
  0x22   : > { %650 = vmatpush.msra.mxu1 %v621_v15  ;;  %691 = vmatpush.msra.mxu2 %v621_v15 }
  0x26   : > { %875 = vmatmul.msk.bf16.vlgmr.msrb.gmra.mxu3 %vm290_vm2, %v392_v38  ;;  %881 = vmatmul.msk.bf16.vlgmr.msrb.gmra.mxu0 %vm290_vm2, %v429_v39 }
  0x29   : > { %867 = vmatmul.msk.bf16.gmra.mxu1 %vm290_vm2, %v281_v40  ;;  %870 = vmatmul.msk.bf16.gmra.mxu2 %vm290_vm2, %v353_v41 }
  0x36   : > { %876 = vmatmul.msk.bf16.gmra.mxu3 %vm290_vm2, %v393_v48  ;;  %882 = vmatmul.msk.bf16.gmra.mxu0 %vm290_vm2, %v430_v49 }
  0x39   : > { %887 = vmatmul.msk.bf16.vlgmr.msrb.gmra.mxu1 %vm290_vm2, %v466_v50  ;;  %893 = vmatmul.msk.bf16.vlgmr.msrb.gmra.mxu2 %vm290_vm2, %v506_v51 }
  0x46   : > { %899 = vmatmul.msk.bf16.vlgmr.msra.gmra.mxu3 %vm290_vm2, %v543_v58  ;;  %905 = vmatmul.msk.bf16.vlgmr.msra.gmra.mxu0 %vm290_vm2, %v580_v59 }
  0x49   : > { %888 = vmatmul.msk.bf16.gmra.mxu1 %vm290_vm2, %v467_v60  ;;  %894 = vmatmul.msk.bf16.gmra.mxu2 %vm290_vm2, %v507_v61 }
  0x56   : > { %900 = vmatmul.msk.bf16.gmra.mxu3 %vm290_vm2, %v544_v0  ;;  %906 = vmatmul.msk.bf16.gmra.mxu0 %vm290_vm2, %v581_v1 }
  0x93   : > { %v313_v3 = vpop.f32.mrf.mxu0 }
  0x96   : > { %v340_v4 = vpop.f32.mrf.mxu1 }
  0x97   : > { %v341_v25 = vadd.f32 %v340_v4, %v313_v3 }
  0x99   : > { %v318_v6 = vpop.f32.mrf.mxu3 }
  0x9b   : > { %v315_v8 = vpop.f32.mrf.mxu0 }
  0x9c   : > { %v374_v7 = vpop.f32.mrf.mxu2 }
  0x9d   : > { %v383_v29 = vadd.f32 %v374_v7, %v341_v25 }
  0x9e   : > { %v342_v9 = vpop.f32.mrf.mxu1 }
  0x9f   : > { %v343_v34 = vadd.f32 %v342_v9, %v315_v8 }
  0xa1   : > { %v320_v11 = vpop.f32.mrf.mxu3 }
  0xa3   : > { %v451_v13 = vpop.f32.mrf.mxu0 }
  0xa4   : > { %v376_v12 = vpop.f32.mrf.mxu2 }
  0xa5   : > { %v384_v37 = vadd.f32 %v376_v12, %v343_v34 }
  0xa6   : > { %v345_v14 = vpop.f32.mrf.mxu1 }
  0xa7   : > { %v346_v46 = vadd.f32 %v345_v14, %v318_v6 }
  0xa9   : > { %v414_v16 = vpop.f32.mrf.mxu3 }
  0xaa   : > { %v423_v30 = vadd.f32 %v414_v16, %v383_v29  ;;  %v961_v29 = vld [vmem:[%s1217_s4] ss:$0 sm:$0xff] }
  0xab   : > { %v453_v18 = vpop.f32.mrf.mxu0 }
  0xac   : > { %v379_v17 = vpop.f32.mrf.mxu2  ;;  %v460_v35 = vadd.f32 %v451_v13, %v423_v30 }
  0xad   : > { %v385_v50 = vadd.f32 %v379_v17, %v346_v46 }
  0xae   : > { %v347_v19 = vpop.f32.mrf.mxu1 }
  0xb1   : > { %v416_v20 = vpop.f32.mrf.mxu3 }
  0xb2   : > { %v424_v39 = vadd.f32 %v416_v20, %v384_v37 }
  0xb3   : > { %v456_v22 = vpop.f32.mrf.mxu0 }
  0xb4   : > { %v381_v21 = vpop.f32.mrf.mxu2  ;;  %v461_v47 = vadd.f32 %v453_v18, %v424_v39 }
  0xb6   : > { %v488_v23 = vpop.f32.mrf.mxu1 }
  0xb7   : > { %v497_v38 = vadd.f32 %v488_v23, %v460_v35 }
  0xb9   : > { %v419_v24 = vpop.f32.mrf.mxu3 }
  0xba   : > { %v425_v53 = vadd.f32 %v419_v24, %v385_v50 }
  0xbb   : > { %v458_v27 = vpop.f32.mrf.mxu0 }
  0xbc   : > { %v528_v26 = vpop.f32.mrf.mxu2  ;;  %v462_v59 = vadd.f32 %v456_v22, %v425_v53 }
  0xbd   : > { %v537_v40 = vadd.f32 %v528_v26, %v497_v38 }
  0xbe   : > { %v490_v28 = vpop.f32.mrf.mxu1 }
  0xbf   : > { %v498_v51 = vadd.f32 %v490_v28, %v461_v47 }
  0xc1   : > { %v421_v31 = vpop.f32.mrf.mxu3 }
  0xc3   : > { %v602_v33 = vpop.f32.mrf.mxu0 }
  0xc4   : > { %v530_v32 = vpop.f32.mrf.mxu2 }
  0xc5   : > { %v538_v54 = vadd.f32 %v530_v32, %v498_v51 }
  0xc6   : > { %v493_v36 = vpop.f32.mrf.mxu1 }
  0xc7   : > { %v499_v61 = vadd.f32 %v493_v36, %v462_v59 }
  0xc9   : > { %v565_v41 = vpop.f32.mrf.mxu3 }
  0xca   : > { %v574_v42 = vadd.f32 %v565_v41, %v537_v40 }
  0xcb   : > { %v604_v45 = vpop.f32.mrf.mxu0 }
  0xcc   : > { %v533_v44 = vpop.f32.mrf.mxu2  ;;  %v611_v48 = vadd.f32 %v602_v33, %v574_v42  ;;  %v962_v33 = vld [vmem:[%s1218_s5] ss:$0 sm:$0xff] }
  0xcd   : > { %v539_v63 = vadd.f32 %v533_v44, %v499_v61 }
  0xce   : > { %v495_v49 = vpop.f32.mrf.mxu1  ;;  %v618_v52 = vadd.f32 %v960_v43, %v611_v48 }
  0xd0   : > { %907 = vmatmul.msk.f32.vlgmr.msra.gmra.mxu1 %vm625_vm3, %v618_v52 }
  0xd1   : > { %v567_v55 = vpop.f32.mrf.mxu3 }
  0xd2   : > { %v575_v56 = vadd.f32 %v567_v55, %v538_v54 }
  0xd3   : > { %v607_v57 = vpop.f32.mrf.mxu0 }
  0xd4   : > { %v535_v58 = vpop.f32.mrf.mxu2  ;;  %v612_v60 = vadd.f32 %v604_v45, %v575_v56 }
  0xd6   : > { %v619_v62 = vadd.f32 %v960_v43, %v612_v60 }
  0xd8   : > { %908 = vmatmul.msk.f32.gmra.mxu1 %vm625_vm3, %v619_v62 }
  0xd9   : > { %v570_v0 = vpop.f32.mrf.mxu3 }
  0xda   : > { %v576_v1 = vadd.f32 %v570_v0, %v539_v63 }
  0xdb   : > { %v609_v2 = vpop.f32.mrf.mxu0 }
  0xdc   : > { %v613_v3 = vadd.f32 %v607_v57, %v576_v1 }
  0xde   : > { %v620_v4 = vadd.f32 %v960_v43, %v613_v3 }
  0xe0   : > { %909 = vmatmul.msk.f32.gmra.mxu1 %vm625_vm3, %v620_v4 }
  0xe1   : > { %v572_v5 = vpop.f32.mrf.mxu3 }
 0x14d   : > { %v652_v6 = vpop.f32.mrf.mxu1 }
 0x14e   : > { %v661_v7 = vsub.f32 %v618_v52, %v652_v6 }
 0x150   : > { %v664_v8 = vmul.f32 %v661_v7, %v661_v7 }
 0x152   : > { %910 = vmatmul.msk.f32.vlgmr.msra.gmra.mxu2 %vm625_vm3, %v664_v8 }
 0x155   : > { %v655_v9 = vpop.f32.mrf.mxu1 }
 0x156   : > { %v662_v10 = vsub.f32 %v619_v62, %v655_v9 }
 0x158   : > { %v665_v11 = vmul.f32 %v662_v10, %v662_v10 }
 0x15a   : > { %911 = vmatmul.msk.f32.gmra.mxu2 %vm625_vm3, %v665_v11 }
 0x15d   : > { %v658_v12 = vpop.f32.mrf.mxu1 }
 0x15e   : > { %v1178_v13 = vsub.f32 %v620_v4, %v658_v12 }
 0x160   : > { %v666_v14 = vmul.f32 %v1178_v13, %v1178_v13 }
 0x162   : > { %912 = vmatmul.msk.f32.gmra.mxu2 %vm625_vm3, %v666_v14 }
 0x1d5   : > { %v693_v15 = vpop.f32.mrf.mxu2 }
 0x1d6   : > { %v694_v16 = vadd.f32 1e-05, %v693_v15 }
 0x1d8   : > { %963 = vrsqrt.f32 %v694_v16  ;;  %vm708_vm5 = vweird.f32 %v694_v16 }
 0x1dd   : > { %v696_v17 = vpop.f32.mrf.mxu2 }
 0x1de   : > { %v964_v18 = vpop.eup %963  ;;  %v697_v19 = vadd.f32 1e-05, %v696_v17 }
 0x1df   : > { %v703_v20 = vmul.f32 %v964_v18, %v694_v16  ;;  %vm709_vm4 = vweird.f32 %v964_v18 }
 0x1e0   : > { %965 = vrsqrt.f32 %v697_v19  ;;  %vm710_vm6 = vmor %vm708_vm5, %vm709_vm4  ;;  %vm718_vm8 = vweird.f32 %v697_v19 }
 0x1e1   : > { %v704_v21 = vmul.f32 %v964_v18, %v703_v20 }
 0x1e3   : > { %v705_v22 = vmul.f32 0.5, %v704_v21 }
 0x1e5   : > { %v706_v23 = vsub.f32 1.5, %v705_v22  ;;  %v699_v24 = vpop.f32.mrf.mxu2 }
 0x1e6   : > { %v966_v25 = vpop.eup %965  ;;  %v700_v26 = vadd.f32 1e-05, %v699_v24 }
 0x1e7   : > { %v707_v27 = vmul.f32 %v964_v18, %v706_v23  ;;  %v713_v28 = vmul.f32 %v966_v25, %v697_v19  ;;  %vm719_vm7 = vweird.f32 %v966_v25 }
 0x1e8   : > { %967 = vrsqrt.f32 %v700_v26  ;;  %vm720_vm10 = vmor %vm718_vm8, %vm719_vm7  ;;  %vm728_vm12 = vweird.f32 %v700_v26 }
 0x1e9   : > { %v711_v30 = vsel %vm710_vm6, %v964_v18, %v707_v27  ;;  %v714_v31 = vmul.f32 %v966_v25, %v713_v28 }
 0x1ea   : > { %v732_v32 = vmul.f32 %v711_v30, %v661_v7 }
 0x1eb   : > { %v715_v34 = vmul.f32 0.5, %v714_v31 }
 0x1ec   : > { %v739_v35 = vmul.f32 %v961_v29, %v732_v32 }
 0x1ed   : > { %v716_v36 = vsub.f32 1.5, %v715_v34 }
 0x1ee   : > { %v968_v37 = vpop.eup %967  ;;  %v746_v38 = vadd.f32 %v962_v33, %v739_v35 }
 0x1ef   : > { %v717_v39 = vmul.f32 %v966_v25, %v716_v36  ;;  %v723_v40 = vmul.f32 %v968_v37, %v700_v26  ;;  %vm729_vm11 = vweird.f32 %v968_v37 }
 0x1f0   : > { %vm749_vm9 = vcmp.ge.f32.partialorder %v746_v38, 0.0  ;;  %v752_v41 = vmul.f32 0.01, %v746_v38  ;;  %vm730_vm14 = vmor %vm728_vm12, %vm729_vm11 }
 0x1f1   : > { %v721_v42 = vsel %vm720_vm10, %v966_v25, %v717_v39  ;;  %v724_v43 = vmul.f32 %v968_v37, %v723_v40 }
 0x1f2   : > { %v755_v44 = vsel %vm749_vm9, %v746_v38, %v752_v41  ;;  %v733_v45 = vmul.f32 %v721_v42, %v662_v10 }
 0x1f3   : > { %758 = vst.msk [vmem:[%s273_s12] sm:$0xff] %vm625_vm3, %v755_v44  ;;  %v725_v46 = vmul.f32 0.5, %v724_v43 }
 0x1f4   : > { %v740_v47 = vmul.f32 %v961_v29, %v733_v45 }
 0x1f5   : > { %v726_v48 = vsub.f32 1.5, %v725_v46 }
 0x1f6   : > { %v747_v49 = vadd.f32 %v962_v33, %v740_v47 }
 0x1f7   : > { %v727_v50 = vmul.f32 %v968_v37, %v726_v48 }
 0x1f8   : > { %vm750_vm13 = vcmp.ge.f32.partialorder %v747_v49, 0.0  ;;  %v753_v51 = vmul.f32 0.01, %v747_v49 }
 0x1f9   : > { %v731_v52 = vsel %vm730_vm14, %v968_v37, %v727_v50 }
 0x1fa   : > { %v756_v53 = vsel %vm750_vm13, %v747_v49, %v753_v51  ;;  %v734_v54 = vmul.f32 %v731_v52, %v1178_v13 }
 0x1fb   : > { %759 = vst.msk [vmem:[%s273_s12 + $0x8] sm:$0xff] %vm625_vm3, %v756_v53 }
 0x1fc   : > { %v741_v55 = vmul.f32 %v961_v29, %v734_v54 }
 0x1fe   : > { %v748_v56 = vadd.f32 %v962_v33, %v741_v55 }
 0x200   : > { %vm751_vm15 = vcmp.ge.f32.partialorder %v748_v56, 0.0  ;;  %v754_v57 = vmul.f32 0.01, %v748_v56 }
 0x202   : > { %v757_v58 = vsel %vm751_vm15, %v748_v56, %v754_v57 }
 0x203   : > { %761 = vst.msk [vmem:[%s273_s12 + $0x10] sm:$0xf] %vm760_vm0, %v757_v58 }
 0x204 PF: > { %s16_s25 = sadd.s32 1, %s1007_s25   ;;  %s1220_s21 = smov %s999_s23 }
 0x205   : > { %p13_p7 = scmp.ge.s32.totalorder %s16_s25, 42   ;;  %s1221_s22 = smov %s1003_s24 }
 0x206   : > { %s1222_s23 = smov %s1225_s26  ;;  %s1223_s24 = smov %s1229_s27 }
 0x207   :  { %15 = sbr.rel (!%p13_p7) target bundleno = 3 (0x3), region = 85 }

// kernel: encoder_forward.8
= control target key start
LH: loop header
LB: loop body
LE: loop exit
PB: predicated region body
PF: predicated region fallthrough
CT: control target
= control target key end

     0   :  { %s250_s6 = smov 0   ;;  %s267_s0 = inlined_call_operand.vmem [shape: f32[2,4,2,4,64], index: 0, kind: input, shape index: {}]   ;;  %s268_s1 = inlined_call_operand.vmem [shape: f32[2,4,4,32], index: 1, kind: output, shape index: {}]  }
   0x1 LB: > { %s209_s7 = sadd.s32 4294967295, %s237_s6   ;;  %p213_p0 = scmp.ge.s32.totalorder %s237_s6, 1  ;;  %s237_s6 = sphi %s250_s6, %s11_s6  }
   0x2   : > { %p87_p1 = scmp.lt.s32.totalorder %s237_s6, 3 }
   0x4   : > { %p88_p2 = pnand %p213_p0, %p87_p1 }
   0x5   : > { %p107_p3 = scmp.lt.s32.totalorder (!%p88_p2), %s209_s7, 1  ;;  %s239_s12 = smov (!%p88_p2), 96  }
   0x6   : > { %91 = sbr.rel (%p88_p2) target bundleno = 144 (0x90), region = 24 }
   0xb   : > { %s270_s7 = smov (!%p107_p3, %s209_s7), 1  ;;  %vm149_vm0 = vcmask 257024  }
   0xc   : > { %s220_s8 = sshll.u32 %s270_s7, 5  ;;  %s221_s13 = sshll.u32 %s270_s7, 4 }
   0xd   : > { %s111_s11 = scalar_lea.vmem %s267_s0, %s220_s8  ;;  %s116_s16 = scalar_lea.vmem %s268_s1, %s221_s13 }
   0xe   : > { %v121_v0 = vld [vmem:[%s111_s11 + $0x10] sm:$0xf]  ;;  %v122_v1 = vld [vmem:[%s111_s11 + $0x14] sm:$0xf]  ;;  %v117_v2 = vld [vmem:[%s111_s11] sm:$0xf] }
   0xf   : > { %v127_v3 = vmax.f32 %v121_v0, %v122_v1  ;;  %v118_v4 = vld [vmem:[%s111_s11 + $0x4] sm:$0xf]  ;;  %v123_v6 = vld [vmem:[%s111_s11 + $0x18] sm:$0xf]  ;;  %v124_v7 = vld [vmem:[%s111_s11 + $0x1c] sm:$0xf] }
  0x10   : > { %v125_v5 = vmax.f32 %v117_v2, %v118_v4  ;;  %v119_v8 = vld [vmem:[%s111_s11 + $0x8] sm:$0xf]  ;;  %v120_v9 = vld [vmem:[%s111_s11 + $0xc] sm:$0xf]  ;;  %v128_v10 = vmax.f32 %v123_v6, %v124_v7 }
  0x11   : > { %137 = vrot.lane.b32.xlu1 %v127_v3, %s239_s12  ;;  %v126_v11 = vmax.f32 %v119_v8, %v120_v9 }
  0x12   : > { %133 = vrot.lane.b32.xlu0 %v125_v5, %s239_s12 }
  0x19   : > { %139 = vrot.lane.b32.xlu1 %v128_v10, %s239_s12 }
  0x1a   : > { %135 = vrot.lane.b32.xlu0 %v126_v11, %s239_s12 }
  0x83   : > { %v138_v12 = vpop.permute.xlu1 %137 }
  0x84   : > { %v147_v13 = vmax.f32 %v127_v3, %v138_v12  ;;  %v134_v14 = vpop.permute.xlu0 %133 }
  0x85   : > { %v145_v15 = vmax.f32 %v125_v5, %v134_v14 }
  0x86   : > { %152 = vst.msk [vmem:[%s116_s16 + $0x8] sm:$0xf] %vm149_vm0, %v147_v13 }
  0x87   : > { %150 = vst.msk [vmem:[%s116_s16] sm:$0xf] %vm149_vm0, %v145_v15 }
  0x8b   : > { %v140_v16 = vpop.permute.xlu1 %139 }
  0x8c   : > { %v148_v17 = vmax.f32 %v128_v10, %v140_v16  ;;  %v136_v18 = vpop.permute.xlu0 %135 }
  0x8d   : > { %v146_v19 = vmax.f32 %v126_v11, %v136_v18 }
  0x8e   : > { %153 = vst.msk [vmem:[%s116_s16 + $0xc] sm:$0xf] %vm149_vm0, %v148_v17 }
  0x8f   : > { %151 = vst.msk [vmem:[%s116_s16 + $0x4] sm:$0xf] %vm149_vm0, %v146_v19 }
  0x90 PF: > { %s11_s6 = sadd.s32 1, %s237_s6  }
  0x91   : > { %p8_p4 = scmp.ge.s32.totalorder %s11_s6, 4  }
  0x93   :  { %10 = sbr.rel (!%p8_p4) target bundleno = 1 (0x1), region = 54 }

// kernel: encoder_forward.7
= control target key start
LH: loop header
LB: loop body
LE: loop exit
PB: predicated region body
PF: predicated region fallthrough
CT: control target
= control target key end

     0   :  { %s1355_s13 = smov 0   ;;  %s1357_s14 = smov 0   ;;  %s1555_s0 = inlined_call_operand.vmem [shape: f32[2,10,10,32], index: 0, kind: input, shape index: {}]   ;;  %s1556_s1 = inlined_call_operand.vmem [shape: bf16[9,32,32], index: 1, kind: input, shape index: {}]   ;;  %s1557_s2 = inlined_call_operand.vmem [shape: f32[1,32], index: 2, kind: input, shape index: {}]   ;;  %s1558_s3 = inlined_call_operand.vmem [shape: f32[32,32], index: 3, kind: input, shape index: {}]   ;;  %s1559_s4 = inlined_call_operand.vmem [shape: f32[1,32], index: 4, kind: input, shape index: {}]   ;;  %s1560_s5 = inlined_call_operand.vmem [shape: f32[1,32], index: 5, kind: input, shape index: {}]   ;;  %s1561_s6 = inlined_call_operand.vmem [shape: bf16[32,128], index: 6, kind: input, shape index: {}]   ;;  %s1562_s7 = inlined_call_operand.vmem [shape: f32[1,128], index: 7, kind: input, shape index: {}]   ;;  %s1563_s8 = inlined_call_operand.vmem [shape: bf16[128,32], index: 8, kind: input, shape index: {}]   ;;  %s1564_s9 = inlined_call_operand.vmem [shape: f32[1,32], index: 9, kind: input, shape index: {}]   ;;  %s1565_s10 = inlined_call_operand.vmem [shape: f32[2,8,8,32], index: 10, kind: output, shape index: {}]  }
   0x1   :  { %s1359_s15 = smov 0   ;;  %s1361_s16 = smov 0  }
   0x2   :  { %s1363_s17 = smov 0  }
   0x3 LB: > { %s29_s18 = sadd.s32 1, %s1290_s15  ;;  %s32_s19 = sadd.s32 1, %s1294_s16  ;;  %s1298_s17 = sphi %s1363_s17, %s20_s17   ;;  %s1294_s16 = sphi %s1361_s16, %s1569_s16   ;;  %s1290_s15 = sphi %s1359_s15, %s1568_s15   ;;  %s1286_s14 = sphi %s1357_s14, %s1567_s14   ;;  %s1282_s13 = sphi %s1355_s13, %s1566_s13  }
   0x4   : > { %p30_p0 = scmp.ge.s32.totalorder %s29_s18, 8  ;;  %p1011_p1 = scmp.ge.s32.totalorder %s1298_s17, 1 }
   0x5   : > { %p326_p2 = scmp.lt.s32.totalorder %s1298_s17, 17 }
   0x6   : > { %s1571_s18 = smov (%p30_p0, %s29_s18), 0  ;;  %s1573_s19 = smov (!%p30_p0, %s32_s19), %s1294_s16 }
   0x7   : > { %p327_p3 = pnand %p1011_p1, %p326_p2  ;;  %p34_p4 = scmp.ge.s32.totalorder %s1573_s19, 2 }
   0x8   : > { %p367_p5 = scmp.lt.s32.totalorder (!%p327_p3), %s1286_s14, 1  ;;  %s1015_s22 = sshll.u32 (!%p327_p3), %s1282_s13, 4 }
   0x9   : > { %s1575_s19 = smov (%p34_p4, %s1573_s19), 0  ;;  %330 = sbr.rel (%p327_p3) target bundleno = 777 (0x309), region = 60 }
   0xa   : > { %p374_p6 = scmp.lt.s32.totalorder (!%p327_p3), %s1282_s13, 7 }
   0xe   : > { %v1185_v0 = vld [vmem:[%s1556_s1 + $0x18] sm:$0xff]  ;;  %v1187_v1 = vld [vmem:[%s1556_s1 + $0x28] sm:$0xff]  ;;  %v1184_v3 = vld [vmem:[%s1556_s1 + $0x10] sm:$0xff]  ;;  %s1577_s14 = smov (!%p367_p5, %s1286_s14), 1  ;;  %vm408_vm0 = vcmask 261120   ;;  %s1579_s13 = smov (!%p374_p6, %s1282_s13), 7 }
   0xf   : > { %v1189_v2 = vld [vmem:[%s1556_s1 + $0x38] sm:$0xff]  ;;  %418 = vmatpush.bf16.msra.mxu1 %v1185_v0  ;;  %481 = vmatpush.bf16.msra.mxu2 %v1187_v1  ;;  %v1186_v4 = vld [vmem:[%s1556_s1 + $0x20] sm:$0xff]  ;;  %v1191_v5 = vld [vmem:[%s1556_s1 + $0x48] sm:$0xff]  ;;  %s1210_s21 = smul.u32 160, %s1577_s14  ;;  %s1013_s23 = sshll.u32 %s1577_s14, 3 }
  0x10   : > { %520 = vmatpush.bf16.msra.mxu3 %v1189_v2  ;;  %v1183_v6 = vld [vmem:[%s1556_s1 + $0x8] sm:$0xff]  ;;  %v1188_v7 = vld [vmem:[%s1556_s1 + $0x30] sm:$0xff]  ;;  %v1197_v8 = vld [vmem:[%s1556_s1 + $0x78] sm:$0xff] }
  0x11   : > { %v1199_v9 = vld [vmem:[%s1556_s1 + $0x88] sm:$0xff]  ;;  %s371_s11 = scalar_lea.vmem %s1555_s0, %s1210_s21  ;;  %v1190_v10 = vld [vmem:[%s1556_s1 + $0x40] sm:$0xff]  ;;  %v1193_v19 = vld [vmem:[%s1556_s1 + $0x58] sm:$0xff]  ;;  %s377_s21 = sadd.s32 %s1013_s23, %s1579_s13 }
  0x12   : > { %s1424_s12 = scalar_lea.vmem %s371_s11, %s1015_s22  ;;  %703 = vmatpush.bf16.msra.mxu0 %v1199_v9  ;;  %v1182_v17 = vld [vmem:[%s1556_s1] sm:$0xff]  ;;  %v1195_v18 = vld [vmem:[%s1556_s1 + $0x68] sm:$0xff]  ;;  %v1196_v20 = vld [vmem:[%s1556_s1 + $0x70] sm:$0xff]  ;;  %s1014_s25 = sshll.u32 %s377_s21, 3 }
  0x13   : > { %419 = vmatpush.bf16.msra.mxu1 %v1184_v3  ;;  %482 = vmatpush.bf16.msra.mxu2 %v1186_v4  ;;  %v389_v11 = vld [vmem:[%s1424_s12 + $0x1] sm:$0xff]  ;;  %v1052_v13 = vld [vmem:[%s1424_s12 + $0x10] sm:$0xff]  ;;  %v719_v36 = vld [vmem:[%s1558_s3 + $0x18] sm:$0xff] }
  0x14   : > { %v453_v12 = vld [vmem:[%s1424_s12 + $0x2] sm:$0xff]  ;;  %521 = vmatpush.bf16.msra.mxu3 %v1188_v7  ;;  %v390_v14 = vpack.c.bf16 %v389_v11, %v389_v11  ;;  %v493_v16 = vpack.c.bf16 %v1052_v13, %v1052_v13  ;;  %v1192_v24 = vld [vmem:[%s1556_s1 + $0x50] sm:$0xff]  ;;  %v1251_v0 = vld [vmem:[%s1557_s2] ss:$0 sm:$0xff] }
  0x15   : > { %v454_v15 = vpack.c.bf16 %v453_v12, %v453_v12  ;;  %v1198_v21 = vld [vmem:[%s1556_s1 + $0x80] sm:$0xff]  ;;  %v1460_v27 = vld [vmem:[%s1424_s12 + $0x11] sm:$0xff]  ;;  %v717_v43 = vld [vmem:[%s1558_s3 + $0x8] sm:$0xff] }
  0x16   : > { %1028 = vmatmul.msk.bf16.vlgmr.msra.gmra.mxu1 %vm408_vm0, %v390_v14  ;;  %v1123_v22 = vld [vmem:[%s1424_s12 + $0x22] sm:$0xff]  ;;  %704 = vmatpush.bf16.msra.mxu0 %v1198_v21  ;;  %v529_v30 = vpack.c.bf16 %v1460_v27, %v1460_v27  ;;  %v1080_v32 = vld [vmem:[%s1424_s12 + $0x12] sm:$0xff] }
  0x17   : > { %556 = vmatpush.bf16.msrb.mxu2 %v1191_v5  ;;  %446 = vmatpush.bf16.msrb.mxu1 %v1183_v6  ;;  %v1194_v23 = vld [vmem:[%s1556_s1 + $0x60] sm:$0xff]  ;;  %v676_v25 = vpack.c.bf16 %v1123_v22, %v1123_v22  ;;  %v565_v34 = vpack.c.bf16 %v1080_v32, %v1080_v32  ;;  %v718_v38 = vld [vmem:[%s1558_s3 + $0x10] sm:$0xff]  ;;  %v1201_v7 = vld [vmem:[%s1561_s6 + $0x8] sm:$0xff] }
  0x18   : > { %667 = vmatpush.bf16.msrb.mxu3 %v1197_v8  ;;  %1050 = vmatmul.msk.bf16.vlgmr.msra.gmra.mxu2 %vm408_vm0, %v454_v15  ;;  %v383_v26 = vld [vmem:[%s1424_s12] sm:$0xff]  ;;  %v1209_v9 = vld [vmem:[%s1563_s8 + $0x38] sm:$0xff] }
  0x19   : > { %1065 = vmatmul.msk.bf16.vlgmr.msra.gmra.mxu3 %vm408_vm0, %v493_v16  ;;  %1136 = vmatmul.msk.bf16.vlgmr.msra.gmra.mxu0 %vm408_vm0, %v676_v25  ;;  %v1109_v28 = vld [vmem:[%s1424_s12 + $0x21] sm:$0xff]  ;;  %v384_v29 = vpack.c.bf16 %v383_v26, %v383_v26  ;;  %v1253_v22 = vld [vmem:[%s1560_s5] ss:$0 sm:$0xff] }
  0x1a   : > { %v640_v31 = vpack.c.bf16 %v1109_v28, %v1109_v28  ;;  %v1095_v33 = vld [vmem:[%s1424_s12 + $0x20] sm:$0xff]  ;;  %904 = vmatpush.bf16.msrb.mxu0 %v1209_v9  ;;  %v1207_v26 = vld [vmem:[%s1563_s8 + $0x28] sm:$0xff]  ;;  %s379_s12 = scalar_lea.vmem %s1565_s10, %s1014_s25 }
  0x1b   : > { %557 = vmatpush.bf16.msrb.mxu2 %v1190_v10  ;;  %447 = vmatpush.bf16.msrb.mxu1 %v1182_v17  ;;  %v604_v35 = vpack.c.bf16 %v1095_v33, %v1095_v33  ;;  %v716_v44 = vld [vmem:[%s1558_s3] sm:$0xff]  ;;  %v1208_v10 = vld [vmem:[%s1563_s8 + $0x30] sm:$0xff] }
  0x1c   : > { %668 = vmatpush.bf16.msrb.mxu3 %v1196_v20  ;;  %v1200_v8 = vld [vmem:[%s1561_s6] sm:$0xff] }
  0x1d   : > { %v1206_v28 = vld [vmem:[%s1563_s8 + $0x20] sm:$0xff] }
  0x1e   : > { %905 = vmatpush.bf16.msrb.mxu0 %v1208_v10  ;;  %v1202_v32 = vld [vmem:[%s1563_s8] sm:$0xff] }
  0x1f   : > { %631 = vmatpush.bf16.msra.mxu2 %v1195_v18  ;;  %592 = vmatpush.bf16.msra.mxu1 %v1193_v19  ;;  %v1252_v19 = vld [vmem:[%s1559_s4] ss:$0 sm:$0xff] }
  0x20   : > { %819 = vmatpush.bf16.msra.mxu3 %v1201_v7  ;;  %v1254_v33 = vld [vmem:[%s1562_s7] ss:$0 sm:$0xff] }
  0x22   : > { %906 = vmatpush.bf16.msrb.mxu0 %v1207_v26 }
  0x23   : > { %632 = vmatpush.bf16.msra.mxu2 %v1194_v23  ;;  %593 = vmatpush.bf16.msra.mxu1 %v1192_v24 }
  0x24   : > { %820 = vmatpush.bf16.msra.mxu3 %v1200_v8 }
  0x26   : > { %1037 = vmatmul.msk.bf16.vlgmr.msrb.gmra.mxu1 %vm408_vm0, %v384_v29  ;;  %907 = vmatpush.bf16.msrb.mxu0 %v1206_v28  ;;  %v1205_v29 = vld [vmem:[%s1563_s8 + $0x18] sm:$0xff] }
  0x27   : > { %735 = vmatpush.msrb.mxu1 %v719_v36 }
  0x28   : > { %1079 = vmatmul.msk.bf16.vlgmr.msrb.gmra.mxu2 %vm408_vm0, %v529_v30  ;;  %v1204_v30 = vld [vmem:[%s1563_s8 + $0x10] sm:$0xff] }
  0x29   : > { %1122 = vmatmul.msk.bf16.vlgmr.msrb.gmra.mxu3 %vm408_vm0, %v640_v31  ;;  %760 = vmatpush.msrb.mxu2 %v719_v36  ;;  %v1203_v31 = vld [vmem:[%s1563_s8 + $0x8] sm:$0xff] }
  0x2a   : > { %736 = vmatpush.msrb.mxu1 %v718_v38  ;;  %908 = vmatpush.bf16.msrb.mxu0 %v1205_v29 }
  0x2b   : > { %761 = vmatpush.msrb.mxu2 %v718_v38 }
  0x2c   : > { %737 = vmatpush.msrb.mxu1 %v717_v43 }
  0x2d   : > { %762 = vmatpush.msrb.mxu2 %v717_v43 }
  0x2e   : > { %738 = vmatpush.msrb.mxu1 %v716_v44  ;;  %909 = vmatpush.bf16.msrb.mxu0 %v1204_v30 }
  0x2f   : > { %763 = vmatpush.msrb.mxu2 %v716_v44 }
  0x32   : > { %910 = vmatpush.bf16.msrb.mxu0 %v1203_v31 }
  0x36   : > { %1093 = vmatmul.msk.bf16.vlgmr.msra.gmra.mxu1 %vm408_vm0, %v565_v34  ;;  %911 = vmatpush.bf16.msrb.mxu0 %v1202_v32 }
  0x38   : > { %1108 = vmatmul.msk.bf16.vlgmr.msra.gmra.mxu2 %vm408_vm0, %v604_v35 }
  0x93   : > { %v421_v37 = vpop.f32.mrf.mxu1 }
  0x96   : > { %v706_v41 = vpop.f32.mrf.mxu0 }
  0x9b   : > { %v484_v39 = vpop.f32.mrf.mxu2  ;;  %v423_v42 = vpop.f32.mrf.mxu1 }
  0x9c   : > { %v523_v40 = vpop.f32.mrf.mxu3 }
  0x9e   : > { %v708_v47 = vpop.f32.mrf.mxu0 }
  0x9f   : > { %v1255_v47 = vld [vmem:[%s1564_s9] ss:$0 sm:$0xff] }
  0xa3   : > { %v486_v45 = vpop.f32.mrf.mxu2  ;;  %v449_v48 = vpop.f32.mrf.mxu1 }
  0xa4   : > { %v525_v46 = vpop.f32.mrf.mxu3  ;;  %v450_v50 = vadd.f32 %v449_v48, %v421_v37 }
  0xa6   : > { %v488_v53 = vadd.f32 %v484_v39, %v450_v50 }
  0xa8   : > { %v527_v55 = vadd.f32 %v523_v40, %v488_v53 }
  0xab   : > { %v559_v49 = vpop.f32.mrf.mxu2  ;;  %v451_v52 = vpop.f32.mrf.mxu1 }
  0xac   : > { %v670_v51 = vpop.f32.mrf.mxu3  ;;  %v563_v58 = vadd.f32 %v559_v49, %v527_v55 }
  0xb3   : > { %v561_v54 = vpop.f32.mrf.mxu2  ;;  %v595_v57 = vpop.f32.mrf.mxu1 }
  0xb4   : > { %v672_v56 = vpop.f32.mrf.mxu3  ;;  %v599_v59 = vadd.f32 %v595_v57, %v563_v58 }
  0xbb   : > { %v634_v60 = vpop.f32.mrf.mxu2  ;;  %v597_v62 = vpop.f32.mrf.mxu1 }
  0xbc   : > { %v638_v61 = vadd.f32 %v634_v60, %v599_v59 }
  0xbe   : > { %v674_v63 = vadd.f32 %v670_v51, %v638_v61 }
  0xc0   : > { %v710_v1 = vadd.f32 %v706_v41, %v674_v63 }
  0xc2   : > { %v715_v2 = vadd.f32 %v1251_v0, %v710_v1 }
  0xc3   : > { %v636_v3 = vpop.f32.mrf.mxu2 }
  0xc4   : > { %1137 = vmatmul.msk.f32.vlgmr.msrb.gmra.mxu1 %vm408_vm0, %v715_v2 }
 0x141   : > { %v740_v4 = vpop.f32.mrf.mxu1 }
 0x142   : > { %v743_v5 = vsub.f32 %v715_v2, %v740_v4 }
 0x144   : > { %v744_v6 = vmul.f32 %v743_v5, %v743_v5 }
 0x146   : > { %1138 = vmatmul.msk.f32.vlgmr.msrb.gmra.mxu2 %vm408_vm0, %v744_v6 }
 0x1c9   : > { %v765_v11 = vpop.f32.mrf.mxu2 }
 0x1ca   : > { %v766_v12 = vadd.f32 1e-05, %v765_v11 }
 0x1cc   : > { %1256 = vrsqrt.f32 %v766_v12  ;;  %vm774_vm2 = vweird.f32 %v766_v12 }
 0x1d2   : > { %v1257_v13 = vpop.eup %1256 }
 0x1d3   : > { %v769_v14 = vmul.f32 %v1257_v13, %v766_v12  ;;  %vm775_vm1 = vweird.f32 %v1257_v13 }
 0x1d4   : > { %vm776_vm3 = vmor %vm774_vm2, %vm775_vm1 }
 0x1d5   : > { %v770_v15 = vmul.f32 %v1257_v13, %v769_v14 }
 0x1d7   : > { %v771_v16 = vmul.f32 0.5, %v770_v15 }
 0x1d9   : > { %v772_v17 = vsub.f32 1.5, %v771_v16 }
 0x1db   : > { %v773_v18 = vmul.f32 %v1257_v13, %v772_v17 }
 0x1dd   : > { %v777_v20 = vsel %vm776_vm3, %v1257_v13, %v773_v18 }
 0x1de   : > { %v778_v21 = vmul.f32 %v777_v20, %v743_v5 }
 0x1e0   : > { %v783_v23 = vmul.f32 %v1252_v19, %v778_v21 }
 0x1e2   : > { %v788_v24 = vadd.f32 %v1253_v22, %v783_v23 }
 0x1e4   : > { %v789_v25 = vpack.c.bf16 %v788_v24, %v788_v24 }
 0x1e6   : > { %1147 = vmatmul.msk.bf16.vlgmr.msra.gmra.mxu3 %vm408_vm0, %v789_v25 }
 0x269   : > { %v822_v34 = vpop.f32.mrf.mxu3 }
 0x26a   : > { %v823_v35 = vadd.f32 %v1254_v33, %v822_v34 }
 0x26c   : > { %v827_v36 = vmul.f32 0.044715, %v823_v35  ;;  %v826_v43 = vmul.f32 0.5, %v823_v35 }
 0x26e   : > { %v828_v37 = vmul.f32 %v827_v36, %v823_v35 }
 0x270   : > { %v829_v38 = vmul.f32 %v828_v37, %v823_v35 }
 0x271   : > { %v824_v39 = vpop.f32.mrf.mxu3 }
 0x272   : > { %v830_v40 = vadd.f32 %v829_v38, %v823_v35 }
 0x274   : > { %v831_v41 = vmul.f32 0.7978846, %v830_v40 }
 0x276   : > { %1258 = vtanh.f32 %v831_v41 }
 0x27c   : > { %v1259_v42 = vpop.eup %1258 }
 0x27d   : > { %v833_v44 = vadd.f32 1.0, %v1259_v42 }
 0x27f   : > { %v834_v45 = vmul.f32 %v833_v44, %v826_v43 }
 0x281   : > { %v835_v46 = vpack.c.bf16 %v834_v45, %v834_v45 }
 0x283   : > { %912 = vmatmul.bf16.vlgmr.msrb.gmra.mxu0 %v835_v46 }
 0x300   : > { %v913_v48 = vpop.f32.mrf.mxu0 }
 0x301   : > { %v914_v49 = vadd.f32 %v1255_v47, %v913_v48 }
 0x303   : > { %v917_v50 = vadd.f32 %v1460_v27, %v914_v49 }
 0x305   : > { %918 = vst.msk [vmem:[%s379_s12] sm:$0xff] %vm408_vm0, %v917_v50 }
 0x308   : > { %v915_v51 = vpop.f32.mrf.mxu0 }
 0x309 PF: > { %s20_s17 = sadd.s32 1, %s1298_s17   ;;  %s1566_s13 = smov %s1290_s15 }
 0x30a   : > { %p17_p7 = scmp.ge.s32.totalorder %s20_s17, 18   ;;  %s1567_s14 = smov %s1294_s16 }
 0x30b   : > { %s1568_s15 = smov %s1571_s18  ;;  %s1569_s16 = smov %s1575_s19 }
 0x30c   :  { %19 = sbr.rel (!%p17_p7) target bundleno = 3 (0x3), region = 101 }

// kernel: encoder_forward.9
= control target key start
LH: loop header
LB: loop body
LE: loop exit
PB: predicated region body
PF: predicated region fallthrough
CT: control target
= control target key end

     0   :  { %s870_s12 = smov 0   ;;  %s872_s13 = smov 0   ;;  %s1007_s0 = inlined_call_operand.vmem [shape: f32[2,4,4,32], index: 0, kind: input, shape index: {}]   ;;  %s1008_s1 = inlined_call_operand.vmem [shape: bf16[9,32,24], index: 1, kind: input, shape index: {}]   ;;  %s1009_s2 = inlined_call_operand.vmem [shape: f32[1,24], index: 2, kind: input, shape index: {}]   ;;  %s1010_s3 = inlined_call_operand.vmem [shape: f32[2,2,2,24], index: 3, kind: output, shape index: {}]  }
   0x1   :  { %s874_s14 = smov 0   ;;  %s876_s15 = smov 0  }
   0x2   :  { %s878_s16 = smov 0  }
   0x3 LB: > { %s22_s17 = sadd.s32 1, %s840_s14  ;;  %s25_s18 = sadd.s32 1, %s844_s15  ;;  %s848_s16 = sphi %s878_s16, %s13_s16   ;;  %s844_s15 = sphi %s876_s15, %s1014_s15   ;;  %s840_s14 = sphi %s874_s14, %s1013_s14   ;;  %s836_s13 = sphi %s872_s13, %s1012_s13   ;;  %s832_s12 = sphi %s870_s12, %s1011_s12  }
   0x4   : > { %p23_p0 = scmp.ge.s32.totalorder %s22_s17, 2  ;;  %p621_p1 = scmp.ge.s32.totalorder %s848_s16, 1 }
   0x5   : > { %p151_p2 = scmp.lt.s32.totalorder %s848_s16, 5 }
   0x6   : > { %s1016_s17 = smov (%p23_p0, %s22_s17), 0  ;;  %s1018_s18 = smov (!%p23_p0, %s25_s18), %s844_s15 }
   0x7   : > { %p152_p3 = pnand %p621_p1, %p151_p2  ;;  %p27_p4 = scmp.ge.s32.totalorder %s1018_s18, 2 }
   0x8   : > { %p178_p5 = scmp.lt.s32.totalorder (!%p152_p3), %s836_s13, 1  ;;  %s626_s8 = sshll.u32 (!%p152_p3), %s832_s12, 2 }
   0x9   : > { %s1020_s18 = smov (%p27_p4, %s1018_s18), 0  ;;  %155 = sbr.rel (%p152_p3) target bundleno = 188 (0xbc), region = 32 }
   0xa   : > { %p185_p6 = scmp.lt.s32.totalorder (!%p152_p3), %s832_s12, 1 }
   0xe   : > { %v754_v0 = vld [vmem:[%s1008_s1 + $0x18] sm:$0xff]  ;;  %v752_v1 = vld [vmem:[%s1008_s1 + $0x8] sm:$0xff]  ;;  %v753_v4 = vld [vmem:[%s1008_s1 + $0x10] sm:$0xff]  ;;  %s1022_s13 = smov (!%p178_p5, %s836_s13), 1  ;;  %vm219_vm0 = vcmask 261120   ;;  %s1024_s12 = smov (!%p185_p6, %s832_s12), 1 }
   0xf   : > { %v756_v2 = vld [vmem:[%s1008_s1 + $0x28] sm:$0xff]  ;;  %v758_v3 = vld [vmem:[%s1008_s1 + $0x38] sm:$0xff]  ;;  %229 = vmatpush.bf16.msra.mxu0 %v754_v0  ;;  %257 = vmatpush.bf16.msra.mxu1 %v752_v1  ;;  %v751_v5 = vld [vmem:[%s1008_s1] sm:$0xff]  ;;  %s750_s9 = sshll.u32 %s1022_s13, 4  ;;  %s624_s21 = sshll.u32 %s1022_s13, 1  ;;  %vm527_vm1 = vcmask 189440  }
  0x10   : > { %292 = vmatpush.bf16.msra.mxu2 %v756_v2  ;;  %331 = vmatpush.bf16.msra.mxu3 %v758_v3  ;;  %v755_v6 = vld [vmem:[%s1008_s1 + $0x20] sm:$0xff]  ;;  %v757_v7 = vld [vmem:[%s1008_s1 + $0x30] sm:$0xff]  ;;  %v760_v8 = vld [vmem:[%s1008_s1 + $0x48] sm:$0xff]  ;;  %s182_s23 = scalar_lea.vmem %s1007_s0, %s750_s9  ;;  %s188_s22 = sadd.s32 %s624_s21, %s1024_s12 }
  0x11   : > { %v764_v9 = vld [vmem:[%s1008_s1 + $0x68] sm:$0xff]  ;;  %v766_v10 = vld [vmem:[%s1008_s1 + $0x78] sm:$0xff]  ;;  %s945_s28 = scalar_lea.vmem %s182_s23, %s626_s8  ;;  %v759_v19 = vld [vmem:[%s1008_s1 + $0x40] sm:$0xff]  ;;  %s625_s23 = sshll.u32 %s188_s22, 1 }
  0x12   : > { %v762_v11 = vld [vmem:[%s1008_s1 + $0x58] sm:$0xff]  ;;  %v200_v12 = vld [vmem:[%s945_s28 + $0x1] sm:$0x3]  ;;  %v663_v18 = vld [vmem:[%s945_s28 + $0x4] sm:$0x3] }
  0x13   : > { %230 = vmatpush.bf16.msra.mxu0 %v753_v4  ;;  %258 = vmatpush.bf16.msra.mxu1 %v751_v5  ;;  %v194_v13 = vld [vmem:[%s945_s28] sm:$0x3]  ;;  %v264_v14 = vld [vmem:[%s945_s28 + $0x2] sm:$0x3]  ;;  %v201_v15 = vpack.c.bf16 %v200_v12, %v200_v12  ;;  %v304_v21 = vpack.c.bf16 %v663_v18, %v663_v18  ;;  %v761_v22 = vld [vmem:[%s1008_s1 + $0x50] sm:$0xff] }
  0x14   : > { %293 = vmatpush.bf16.msra.mxu2 %v755_v6  ;;  %332 = vmatpush.bf16.msra.mxu3 %v757_v7  ;;  %v195_v16 = vpack.c.bf16 %v194_v13, %v194_v13  ;;  %v265_v17 = vpack.c.bf16 %v264_v14, %v264_v14  ;;  %v763_v20 = vld [vmem:[%s1008_s1 + $0x60] sm:$0xff]  ;;  %v765_v23 = vld [vmem:[%s1008_s1 + $0x70] sm:$0xff]  ;;  %v768_v24 = vld [vmem:[%s1008_s1 + $0x88] sm:$0xff] }
  0x15   : > { %v767_v25 = vld [vmem:[%s1008_s1 + $0x80] sm:$0xff]  ;;  %v706_v28 = vld [vmem:[%s945_s28 + $0x8] sm:$0x3]  ;;  %v734_v34 = vld [vmem:[%s945_s28 + $0xa] sm:$0x3] }
  0x16   : > { %639 = vmatmul.msk.bf16.vlgmr.msra.gmra.mxu0 %vm219_vm0, %v201_v15  ;;  %648 = vmatmul.msk.bf16.vlgmr.msra.gmra.mxu1 %vm219_vm0, %v195_v16  ;;  %v677_v26 = vld [vmem:[%s945_s28 + $0x5] sm:$0x3]  ;;  %v720_v29 = vld [vmem:[%s945_s28 + $0x9] sm:$0x3]  ;;  %v415_v32 = vpack.c.bf16 %v706_v28, %v706_v28  ;;  %v487_v35 = vpack.c.bf16 %v734_v34, %v734_v34  ;;  %v809_v59 = vld [vmem:[%s1009_s2] ss:$0 sm:$0xff] }
  0x17   : > { %367 = vmatpush.bf16.msrb.mxu0 %v760_v8  ;;  %403 = vmatpush.bf16.msrb.mxu1 %v762_v11  ;;  %v691_v27 = vld [vmem:[%s945_s28 + $0x6] sm:$0x3]  ;;  %v340_v30 = vpack.c.bf16 %v677_v26, %v677_v26  ;;  %v451_v33 = vpack.c.bf16 %v720_v29, %v720_v29  ;;  %s190_s28 = scalar_lea.vmem %s1010_s3, %s625_s23 }
  0x18   : > { %442 = vmatpush.bf16.msrb.mxu2 %v764_v9  ;;  %478 = vmatpush.bf16.msrb.mxu3 %v766_v10  ;;  %v376_v31 = vpack.c.bf16 %v691_v27, %v691_v27 }
  0x19   : > { %661 = vmatmul.msk.bf16.vlgmr.msra.gmra.mxu2 %vm219_vm0, %v265_v17  ;;  %676 = vmatmul.msk.bf16.vlgmr.msra.gmra.mxu3 %vm219_vm0, %v304_v21 }
  0x1b   : > { %368 = vmatpush.bf16.msrb.mxu0 %v759_v19  ;;  %404 = vmatpush.bf16.msrb.mxu1 %v761_v22 }
  0x1c   : > { %443 = vmatpush.bf16.msrb.mxu2 %v763_v20  ;;  %479 = vmatpush.bf16.msrb.mxu3 %v765_v23 }
  0x1f   : > { %514 = vmatpush.bf16.msra.mxu0 %v768_v24 }
  0x23   : > { %515 = vmatpush.bf16.msra.mxu0 %v767_v25 }
  0x26   : > { %690 = vmatmul.msk.bf16.vlgmr.msrb.gmra.mxu0 %vm219_vm0, %v340_v30  ;;  %704 = vmatmul.msk.bf16.vlgmr.msrb.gmra.mxu1 %vm219_vm0, %v376_v31 }
  0x29   : > { %719 = vmatmul.msk.bf16.vlgmr.msrb.gmra.mxu2 %vm219_vm0, %v415_v32  ;;  %733 = vmatmul.msk.bf16.vlgmr.msrb.gmra.mxu3 %vm219_vm0, %v451_v33 }
  0x36   : > { %747 = vmatmul.msk.bf16.vlgmr.msra.gmra.mxu0 %vm219_vm0, %v487_v35 }
  0x93   : > { %v232_v36 = vpop.f32.mrf.mxu0  ;;  %v260_v37 = vpop.f32.mrf.mxu1 }
  0x94   : > { %v261_v42 = vadd.f32 %v260_v37, %v232_v36 }
  0x9b   : > { %v234_v40 = vpop.f32.mrf.mxu0  ;;  %v262_v41 = vpop.f32.mrf.mxu1 }
  0x9c   : > { %v295_v38 = vpop.f32.mrf.mxu2  ;;  %v334_v39 = vpop.f32.mrf.mxu3 }
  0x9d   : > { %v299_v43 = vadd.f32 %v295_v38, %v261_v42 }
  0x9f   : > { %v338_v48 = vadd.f32 %v334_v39, %v299_v43 }
  0xa3   : > { %v370_v46 = vpop.f32.mrf.mxu0  ;;  %v406_v47 = vpop.f32.mrf.mxu1 }
  0xa4   : > { %v297_v44 = vpop.f32.mrf.mxu2  ;;  %v336_v45 = vpop.f32.mrf.mxu3  ;;  %v374_v49 = vadd.f32 %v370_v46, %v338_v48 }
  0xa6   : > { %v410_v54 = vadd.f32 %v406_v47, %v374_v49 }
  0xab   : > { %v372_v52 = vpop.f32.mrf.mxu0  ;;  %v408_v53 = vpop.f32.mrf.mxu1 }
  0xac   : > { %v445_v50 = vpop.f32.mrf.mxu2  ;;  %v481_v51 = vpop.f32.mrf.mxu3 }
  0xad   : > { %v449_v55 = vadd.f32 %v445_v50, %v410_v54 }
  0xaf   : > { %v485_v56 = vadd.f32 %v481_v51, %v449_v55 }
  0xb3   : > { %v517_v60 = vpop.f32.mrf.mxu0 }
  0xb4   : > { %v447_v57 = vpop.f32.mrf.mxu2  ;;  %v483_v58 = vpop.f32.mrf.mxu3  ;;  %v521_v61 = vadd.f32 %v517_v60, %v485_v56 }
  0xb6   : > { %v526_v62 = vadd.f32 %v809_v59, %v521_v61 }
  0xb8   : > { %528 = vst.msk [vmem:[%s190_s28] sm:$0x3] %vm527_vm1, %v526_v62 }
  0xbb   : > { %v519_v63 = vpop.f32.mrf.mxu0 }
  0xbc PF: > { %s13_s16 = sadd.s32 1, %s848_s16   ;;  %s1011_s12 = smov %s840_s14 }
  0xbd   : > { %p10_p7 = scmp.ge.s32.totalorder %s13_s16, 6   ;;  %s1012_s13 = smov %s844_s15 }
  0xbe   : > { %s1013_s14 = smov %s1016_s17  ;;  %s1014_s15 = smov %s1020_s18 }
  0xbf   :  { %12 = sbr.rel (!%p10_p7) target bundleno = 3 (0x3), region = 73 }

</bundles_post_ra>
